<compile_context>
chip_gen: v6e
topology: v6e:2x2x1
jax: 0.10.0
libtpu: 0.0.40
codegen_flags: <defaults>
</compile_context>

<pallas_src>
import functools

import jax
import jax.numpy as jnp
from jax.experimental import pallas as pl
from jax.experimental.pallas import tpu as pltpu

P_DROP = 0.1
LANE = 128
NEG_INF = -1e30


def _round_up(n, m):
    return ((n + m - 1) // m) * m


def _pad2(a, shape):
    return jnp.pad(a, ((0, shape[0] - a.shape[0]), (0, shape[1] - a.shape[1])))


def _pick_tile(target, n_p):
    """Largest multiple of LANE <= target that divides n_p (n_p is a multiple of LANE)."""
    t = min(_round_up(target, LANE), n_p)
    while n_p % t != 0:
        t -= LANE
    return t


def _masked_softmax_f32(y, out_valid):
    col = jax.lax.broadcasted_iota(jnp.int32, y.shape, 1)
    y = jnp.where(col < out_valid, y, NEG_INF)  # exclude lane-padding columns
    m = jnp.max(y, axis=1, keepdims=True)
    e = jnp.exp(y - m)
    return e / jnp.sum(e, axis=1, keepdims=True)


# ---------------- fused path (small graphs: everything resident in VMEM) ----------------
def _fused_kernel(x_ref, adj_ref, w1_ref, b1_ref, w2_ref, b2_ref, mask_ref, y_ref,
                  *, out_valid):
    xw = jnp.dot(x_ref[...], w1_ref[...], preferred_element_type=jnp.float32) + b1_ref[...]
    h = jnp.dot(adj_ref[...], xw.astype(jnp.bfloat16), preferred_element_type=jnp.float32)
    h = jnp.maximum(h, 0.0) * mask_ref[...].astype(jnp.float32)
    hh = jnp.dot(adj_ref[...], h.astype(jnp.bfloat16), preferred_element_type=jnp.float32)
    y = jnp.dot(hh.astype(jnp.bfloat16), w2_ref[...], preferred_element_type=jnp.float32)
    y = jnp.maximum(y + b2_ref[...], 0.0)
    y_ref[...] = _masked_softmax_f32(y, out_valid).astype(y_ref.dtype)


# ---------------- tiled path (large graphs) ----------------
def _dense_kernel(x_ref, w1_ref, b1_ref, xw_ref):
    # xw = x @ W1 + b1, computed exactly once per row block (no per-(i,k) recompute).
    xw = jnp.dot(x_ref[...], w1_ref[...], preferred_element_type=jnp.float32) + b1_ref[...]
    xw_ref[...] = xw.astype(xw_ref.dtype)


def _agg1_kernel(adj_ref, xw_ref, mask_ref, h_ref, acc_ref):
    # h = dropout(relu(adj @ xw))
    k = pl.program_id(1)

    @pl.when(k == 0)
    def _():
        acc_ref[...] = jnp.zeros_like(acc_ref)

    acc_ref[...] += jnp.dot(adj_ref[...], xw_ref[...], preferred_element_type=jnp.float32)

    @pl.when(k == pl.num_programs(1) - 1)
    def _():
        h = jnp.maximum(acc_ref[...], 0.0)
        # mask holds {0, 1/(1-p)} -> inverted dropout is one multiply
        h_ref[...] = (h * mask_ref[...].astype(jnp.float32)).astype(h_ref.dtype)


def _agg2_kernel(adj_ref, h_ref, w2_ref, b2_ref, y_ref, acc_ref, *, out_valid):
    # y = softmax(relu((adj @ h) @ W2 + b2)): accumulate adj@h, apply W2/b2 once in finalize.
    k = pl.program_id(1)

    @pl.when(k == 0)
    def _():
        acc_ref[...] = jnp.zeros_like(acc_ref)

    acc_ref[...] += jnp.dot(adj_ref[...], h_ref[...], preferred_element_type=jnp.float32)

    @pl.when(k == pl.num_programs(1) - 1)
    def _():
        y = jnp.dot(acc_ref[...].astype(jnp.bfloat16), w2_ref[...],
                    preferred_element_type=jnp.float32)
        y = jnp.maximum(y + b2_ref[...], 0.0)
        y_ref[...] = _masked_softmax_f32(y, out_valid).astype(y_ref.dtype)


def fedgcn_forward(x, adj, w1, b1, w2, b2, keep_mask, *, tm=512, tk=512, force_tiled=False):
    """x:[N,in], adj:[N,N], w1:[in,h] (pre-transposed), b1:[1,h], w2:[h,out], b2:[1,out],
    keep_mask:[N,h] with values in {0, 1/(1-p)}.  Returns softmax probs [N,out] (f32)."""
    N, in_feats = x.shape
    h_feats = w1.shape[1]
    out_feats = w2.shape[1]

    # Padding decoupled from tile size: only round to lane/sublane-friendly 128.
    n_p = _round_up(N, LANE)
    in_p = _round_up(in_feats, LANE)
    h_p = _round_up(h_feats, LANE)
    out_p = _round_up(out_feats, LANE)

    x_p = _pad2(x, (n_p, in_p)).astype(jnp.bfloat16)
    adj_p = _pad2(adj, (n_p, n_p)).astype(jnp.bfloat16)
    w1_p = _pad2(w1, (in_p, h_p)).astype(jnp.bfloat16)
    b1_p = _pad2(b1, (1, h_p)).astype(jnp.float32)
    w2_p = _pad2(w2, (h_p, out_p)).astype(jnp.bfloat16)
    b2_p = _pad2(b2, (1, out_p)).astype(jnp.float32)
    mask_p = _pad2(keep_mask, (n_p, h_p)).astype(jnp.bfloat16)

    # Rough VMEM footprint of the fused path (inputs + f32 intermediates headroom).
    fused_bytes = (
        n_p * n_p * 2
        + n_p * (in_p + 2 * h_p) * 2
        + (in_p * h_p + h_p * out_p) * 2
        + n_p * out_p * 4
        + 3 * n_p * h_p * 4
    )

    if (not force_tiled) and fused_bytes <= (8 << 20):
        # Small graph: one launch, everything VMEM-resident, adj read from HBM exactly once.
        y = pl.pallas_call(
            functools.partial(_fused_kernel, out_valid=out_feats),
            out_shape=jax.ShapeDtypeStruct((n_p, out_p), jnp.float32),
            grid=(1,),
            in_specs=[
                pl.BlockSpec((n_p, in_p), lambda i: (0, 0)),
                pl.BlockSpec((n_p, n_p), lambda i: (0, 0)),
                pl.BlockSpec((in_p, h_p), lambda i: (0, 0)),
                pl.BlockSpec((1, h_p), lambda i: (0, 0)),
                pl.BlockSpec((h_p, out_p), lambda i: (0, 0)),
                pl.BlockSpec((1, out_p), lambda i: (0, 0)),
                pl.BlockSpec((n_p, h_p), lambda i: (0, 0)),
            ],
            out_specs=pl.BlockSpec((n_p, out_p), lambda i: (0, 0)),
            compiler_params=pltpu.CompilerParams(
                dimension_semantics=("arbitrary",),
                vmem_limit_bytes=32 * 1024 * 1024,
            ),
        )(x_p, adj_p, w1_p, b1_p, w2_p, b2_p, mask_p)
        return y[:N, :out_feats]

    # Tiled path: big adj tiles (adjacency-bandwidth bound), clamped to divide n_p.
    tm = _pick_tile(tm, n_p)
    tk = _pick_tile(tk, n_p)
    grid = (n_p // tm, n_p // tk)
    cparams = pltpu.CompilerParams(dimension_semantics=("parallel", "arbitrary"))
    # TODO(synk): on v7x, sweep pltpu.CORE_PARALLEL on grid axis 0 when n_p // tm >= 2.

    # xw = x @ W1 + b1, once (dense part hoisted out of the aggregation grid).
    xw = pl.pallas_call(
        _dense_kernel,
        out_shape=jax.ShapeDtypeStruct((n_p, h_p), jnp.bfloat16),
        grid=(n_p // tm,),
        in_specs=[
            pl.BlockSpec((tm, in_p), lambda i: (i, 0)),
            pl.BlockSpec((in_p, h_p), lambda i: (0, 0)),
            pl.BlockSpec((1, h_p), lambda i: (0, 0)),
        ],
        out_specs=pl.BlockSpec((tm, h_p), lambda i: (i, 0)),
        compiler_params=pltpu.CompilerParams(dimension_semantics=("parallel",)),
    )(x_p, w1_p, b1_p)

    # h = dropout(relu(adj @ xw))
    h = pl.pallas_call(
        _agg1_kernel,
        out_shape=jax.ShapeDtypeStruct((n_p, h_p), jnp.bfloat16),
        grid=grid,
        in_specs=[
            pl.BlockSpec((tm, tk), lambda i, k: (i, k)),      # adj tile
            pl.BlockSpec((tk, h_p), lambda i, k: (k, 0)),     # xw reduction slab
            pl.BlockSpec((tm, h_p), lambda i, k: (i, 0)),     # dropout keep-mask (bf16)
        ],
        out_specs=pl.BlockSpec((tm, h_p), lambda i, k: (i, 0)),
        scratch_shapes=[pltpu.VMEM((tm, h_p), jnp.float32)],
        compiler_params=cparams,
    )(adj_p, xw, mask_p)

    # y = softmax(relu((adj @ h) @ W2 + b2))
    y = pl.pallas_call(
        functools.partial(_agg2_kernel, out_valid=out_feats),
        out_shape=jax.ShapeDtypeStruct((n_p, out_p), jnp.float32),
        grid=grid,
        in_specs=[
            pl.BlockSpec((tm, tk), lambda i, k: (i, k)),      # adj tile
            pl.BlockSpec((tk, h_p), lambda i, k: (k, 0)),     # h reduction slab
            pl.BlockSpec((h_p, out_p), lambda i, k: (0, 0)),  # W2 (resident)
            pl.BlockSpec((1, out_p), lambda i, k: (0, 0)),    # b2
        ],
        out_specs=pl.BlockSpec((tm, out_p), lambda i, k: (i, 0)),
        scratch_shapes=[pltpu.VMEM((tm, h_p), jnp.float32)],
        compiler_params=cparams,
    )(adj_p, h, w2_p, b2_p)

    return y[:N, :out_feats]


def init_params(key, in_feats, h_feats, out_feats):
    """kaiming_normal_ on 2D weights (stored pre-transposed as [in, out]);
    default nn.Linear uniform init on biases."""
    k1, k2, k3, k4 = jax.random.split(key, 4)
    w1 = jax.random.normal(k1, (in_feats, h_feats), jnp.float32) * jnp.sqrt(2.0 / in_feats)
    w2 = jax.random.normal(k2, (h_feats, out_feats), jnp.float32) * jnp.sqrt(2.0 / h_feats)
    b1_bound = 1.0 / jnp.sqrt(in_feats)
    b2_bound = 1.0 / jnp.sqrt(h_feats)
    b1 = jax.random.uniform(k3, (1, h_feats), jnp.float32, -b1_bound, b1_bound)
    b2 = jax.random.uniform(k4, (1, out_feats), jnp.float32, -b2_bound, b2_bound)
    return w1, b1, w2, b2


def _reference(x, adj, w1, b1, w2, b2, keep_mask):
    """Pure-JAX reference mirroring the kernel's bf16 casts (f32 accumulation)."""
    bf = jnp.bfloat16
    xw = jnp.dot(x.astype(bf), w1.astype(bf), preferred_element_type=jnp.float32) + b1
    h = jnp.dot(adj.astype(bf), xw.astype(bf), preferred_element_type=jnp.float32)
    h = jnp.maximum(h, 0.0) * keep_mask.astype(bf).astype(jnp.float32)
    hh = jnp.dot(adj.astype(bf), h.astype(bf), preferred_element_type=jnp.float32)
    y = jnp.dot(hh.astype(bf), w2.astype(bf), preferred_element_type=jnp.float32) + b2
    y = jnp.maximum(y, 0.0)
    return jax.nn.softmax(y, axis=1)


if __name__ == "__main__":
    key = jax.random.PRNGKey(0)
    kx, ka, kp, kd = jax.random.split(key, 4)

    N, in_feats, h_feats, out_feats = 256, 32, 64, 16

    # node features
    x = jax.random.normal(kx, (N, in_feats), jnp.float32)

    # dense row-normalized adjacency with self loops
    a = (jax.random.uniform(ka, (N, N)) < 0.05).astype(jnp.float32)
    a = jnp.maximum(a, a.T) + jnp.eye(N, dtype=jnp.float32)
    adj = a / jnp.sum(a, axis=1, keepdims=True)

    w1, b1, w2, b2 = init_params(kp, in_feats, h_feats, out_feats)

    # dropout keep-mask drawn host-side (matches F.dropout(p=0.1, training=True) semantics;
    # RNG stream differs from torch).  Values are 0 or 1/(1-p).
    keep = jax.random.bernoulli(kd, 1.0 - P_DROP, (N, h_feats))
    keep_mask = keep.astype(jnp.float32) / (1.0 - P_DROP)

    ref = _reference(x, adj, w1, b1, w2, b2, keep_mask)

    # Fused single-launch path (auto-selected at this size).
    out_fused = jax.block_until_ready(fedgcn_forward(x, adj, w1, b1, w2, b2, keep_mask))
    # Tiled accumulator path (forced, small tiles, to exercise the 2x2 grid pipeline).
    out_tiled = jax.block_until_ready(
        fedgcn_forward(x, adj, w1, b1, w2, b2, keep_mask, tm=128, tk=128, force_tiled=True))

    for out in (out_fused, out_tiled):
        assert out.shape == (N, out_feats)
        assert bool(jnp.all(jnp.isfinite(out)))
        assert bool(jnp.allclose(jnp.sum(out, axis=1), 1.0, atol=1e-4))
        assert bool(jnp.allclose(out, ref, atol=1e-2))
    print("KERNEL_OK")
</pallas_src>

<mosaic_0001>
module attributes {stable_mosaic.version = 11 : i64} {
  func.func @_fused_kernel(%arg0: i32, %arg1: memref<256x128xbf16, #tpu.memory_space<vmem>>, %arg2: memref<256x256xbf16, #tpu.memory_space<vmem>>, %arg3: memref<128x128xbf16, #tpu.memory_space<vmem>>, %arg4: memref<1x128xf32, #tpu.memory_space<vmem>>, %arg5: memref<128x128xbf16, #tpu.memory_space<vmem>>, %arg6: memref<1x128xf32, #tpu.memory_space<vmem>>, %arg7: memref<256x128xbf16, #tpu.memory_space<vmem>>, %arg8: memref<256x128xf32, #tpu.memory_space<vmem>>) attributes {dimension_semantics = [#tpu.dimension_semantics<arbitrary>], iteration_bounds = array<i64: 1>, scalar_prefetch = 0 : i64, scratch_operands = 0 : i64, tpu.core_type = #tpu.core_type<tc>, window_params = [{pipeline_mode = #tpu.pipeline_mode<synchronous>, transform_indices = @transform_0, window_bounds = array<i64: 256, 128>}, {pipeline_mode = #tpu.pipeline_mode<synchronous>, transform_indices = @transform_1, window_bounds = array<i64: 256, 256>}, {pipeline_mode = #tpu.pipeline_mode<synchronous>, transform_indices = @transform_2, window_bounds = array<i64: 128, 128>}, {pipeline_mode = #tpu.pipeline_mode<synchronous>, transform_indices = @transform_3, window_bounds = array<i64: 1, 128>}, {pipeline_mode = #tpu.pipeline_mode<synchronous>, transform_indices = @transform_4, window_bounds = array<i64: 128, 128>}, {pipeline_mode = #tpu.pipeline_mode<synchronous>, transform_indices = @transform_5, window_bounds = array<i64: 1, 128>}, {pipeline_mode = #tpu.pipeline_mode<synchronous>, transform_indices = @transform_6, window_bounds = array<i64: 256, 128>}, {pipeline_mode = #tpu.pipeline_mode<synchronous>, transform_indices = @transform_7, window_bounds = array<i64: 256, 128>}]} {
    %c0 = arith.constant 0 : index
    %c0_0 = arith.constant 0 : index
    %0 = vector.load %arg1[%c0, %c0_0] : memref<256x128xbf16, #tpu.memory_space<vmem>>, vector<256x128xbf16>
    %c0_1 = arith.constant 0 : index
    %c0_2 = arith.constant 0 : index
    %1 = vector.load %arg3[%c0_1, %c0_2] : memref<128x128xbf16, #tpu.memory_space<vmem>>, vector<128x128xbf16>
    %cst = arith.constant dense<0.000000e+00> : vector<256x128xf32>
    %2 = tpu.matmul %0, %1, %cst {dimension_numbers = #tpu.dot_dimension_numbers<[1], [0], [0], [1], [0, 0, 1, 1], [], []>} : vector<256x128xbf16>, vector<128x128xbf16>, vector<256x128xf32> -> vector<256x128xf32>
    %c0_3 = arith.constant 0 : index
    %c0_4 = arith.constant 0 : index
    %3 = vector.load %arg4[%c0_3, %c0_4] : memref<1x128xf32, #tpu.memory_space<vmem>>, vector<1x128xf32>
    %4 = vector.broadcast %3 : vector<1x128xf32> to vector<256x128xf32>
    %5 = arith.addf %2, %4 : vector<256x128xf32>
    %c0_5 = arith.constant 0 : index
    %c0_6 = arith.constant 0 : index
    %6 = vector.load %arg2[%c0_5, %c0_6] : memref<256x256xbf16, #tpu.memory_space<vmem>>, vector<256x256xbf16>
    %7 = arith.truncf %5 : vector<256x128xf32> to vector<256x128xbf16>
    %cst_7 = arith.constant dense<0.000000e+00> : vector<256x128xf32>
    %8 = tpu.matmul %6, %7, %cst_7 {dimension_numbers = #tpu.dot_dimension_numbers<[1], [0], [0], [1], [0, 0, 1, 1], [], []>} : vector<256x256xbf16>, vector<256x128xbf16>, vector<256x128xf32> -> vector<256x128xf32>
    %cst_8 = arith.constant 0.000000e+00 : f32
    %9 = vector.broadcast %cst_8 : f32 to vector<256x128xf32>
    %10 = arith.maximumf %8, %9 : vector<256x128xf32>
    %c0_9 = arith.constant 0 : index
    %c0_10 = arith.constant 0 : index
    %11 = vector.load %arg7[%c0_9, %c0_10] : memref<256x128xbf16, #tpu.memory_space<vmem>>, vector<256x128xbf16>
    %12 = arith.extf %11 : vector<256x128xbf16> to vector<256x128xf32>
    %13 = arith.mulf %10, %12 : vector<256x128xf32>
    %c0_11 = arith.constant 0 : index
    %c0_12 = arith.constant 0 : index
    %14 = vector.load %arg2[%c0_11, %c0_12] : memref<256x256xbf16, #tpu.memory_space<vmem>>, vector<256x256xbf16>
    %15 = arith.truncf %13 : vector<256x128xf32> to vector<256x128xbf16>
    %cst_13 = arith.constant dense<0.000000e+00> : vector<256x128xf32>
    %16 = tpu.matmul %14, %15, %cst_13 {dimension_numbers = #tpu.dot_dimension_numbers<[1], [0], [0], [1], [0, 0, 1, 1], [], []>} : vector<256x256xbf16>, vector<256x128xbf16>, vector<256x128xf32> -> vector<256x128xf32>
    %17 = arith.truncf %16 : vector<256x128xf32> to vector<256x128xbf16>
    %c0_14 = arith.constant 0 : index
    %c0_15 = arith.constant 0 : index
    %18 = vector.load %arg5[%c0_14, %c0_15] : memref<128x128xbf16, #tpu.memory_space<vmem>>, vector<128x128xbf16>
    %cst_16 = arith.constant dense<0.000000e+00> : vector<256x128xf32>
    %19 = tpu.matmul %17, %18, %cst_16 {dimension_numbers = #tpu.dot_dimension_numbers<[1], [0], [0], [1], [0, 0, 1, 1], [], []>} : vector<256x128xbf16>, vector<128x128xbf16>, vector<256x128xf32> -> vector<256x128xf32>
    %c0_17 = arith.constant 0 : index
    %c0_18 = arith.constant 0 : index
    %20 = vector.load %arg6[%c0_17, %c0_18] : memref<1x128xf32, #tpu.memory_space<vmem>>, vector<1x128xf32>
    %21 = vector.broadcast %20 : vector<1x128xf32> to vector<256x128xf32>
    %22 = arith.addf %19, %21 : vector<256x128xf32>
    %cst_19 = arith.constant 0.000000e+00 : f32
    %23 = vector.broadcast %cst_19 : f32 to vector<256x128xf32>
    %24 = arith.maximumf %22, %23 : vector<256x128xf32>
    %25 = tpu.iota {dimensions = array<i32: 1>} : vector<256x128xi32>
    %c16_i32 = arith.constant 16 : i32
    %26 = vector.broadcast %c16_i32 : i32 to vector<256x128xi32>
    %27 = arith.cmpi slt, %25, %26 : vector<256x128xi32>
    %cst_20 = arith.constant -1.000000e+30 : f32
    %28 = vector.broadcast %cst_20 : f32 to vector<256x128xf32>
    %29 = arith.select %27, %24, %28 : vector<256x128xi1>, vector<256x128xf32>
    %cst_21 = arith.constant dense<0xFF800000> : vector<256xf32>
    %30 = vector.multi_reduction <maximumf>, %29, %cst_21 [1] : vector<256x128xf32> to vector<256xf32>
    %31 = vector.shape_cast %30 : vector<256xf32> to vector<256x1xf32>
    %32 = vector.broadcast %31 : vector<256x1xf32> to vector<256x128xf32>
    %33 = arith.subf %29, %32 : vector<256x128xf32>
    %34 = math.exp %33 : vector<256x128xf32>
    %cst_22 = arith.constant dense<0.000000e+00> : vector<256xf32>
    %35 = vector.multi_reduction <add>, %34, %cst_22 [1] : vector<256x128xf32> to vector<256xf32>
    %36 = vector.shape_cast %35 : vector<256xf32> to vector<256x1xf32>
    %37 = vector.broadcast %36 : vector<256x1xf32> to vector<256x128xf32>
    %38 = arith.divf %34, %37 : vector<256x128xf32>
    %c0_23 = arith.constant 0 : index
    %c0_24 = arith.constant 0 : index
    %39 = vector.load %arg8[%c0_23, %c0_24] : memref<256x128xf32, #tpu.memory_space<vmem>>, vector<256x128xf32>
    tpu.vector_store %arg8[%c0_23, %c0_24], %38 {strides = array<i32>} : memref<256x128xf32, #tpu.memory_space<vmem>>, vector<256x128xf32>,
    return
  }
  func.func @transform_0(%arg0: i32) -> (i32, i32) {
    %c0_i32 = arith.constant 0 : i32
    %c0_i32_0 = arith.constant 0 : i32
    %c0_i32_1 = arith.constant 0 : i32
    return %c0_i32, %c0_i32_0 : i32, i32
  }
  func.func @transform_1(%arg0: i32) -> (i32, i32) {
    %c0_i32 = arith.constant 0 : i32
    %c0_i32_0 = arith.constant 0 : i32
    %c0_i32_1 = arith.constant 0 : i32
    return %c0_i32, %c0_i32_0 : i32, i32
  }
  func.func @transform_2(%arg0: i32) -> (i32, i32) {
    %c0_i32 = arith.constant 0 : i32
    %c0_i32_0 = arith.constant 0 : i32
    %c0_i32_1 = arith.constant 0 : i32
    return %c0_i32, %c0_i32_0 : i32, i32
  }
  func.func @transform_3(%arg0: i32) -> (i32, i32) {
    %c0_i32 = arith.constant 0 : i32
    %c0_i32_0 = arith.constant 0 : i32
    %c0_i32_1 = arith.constant 0 : i32
    return %c0_i32, %c0_i32_0 : i32, i32
  }
  func.func @transform_4(%arg0: i32) -> (i32, i32) {
    %c0_i32 = arith.constant 0 : i32
    %c0_i32_0 = arith.constant 0 : i32
    %c0_i32_1 = arith.constant 0 : i32
    return %c0_i32, %c0_i32_0 : i32, i32
  }
  func.func @transform_5(%arg0: i32) -> (i32, i32) {
    %c0_i32 = arith.constant 0 : i32
    %c0_i32_0 = arith.constant 0 : i32
    %c0_i32_1 = arith.constant 0 : i32
    return %c0_i32, %c0_i32_0 : i32, i32
  }
  func.func @transform_6(%arg0: i32) -> (i32, i32) {
    %c0_i32 = arith.constant 0 : i32
    %c0_i32_0 = arith.constant 0 : i32
    %c0_i32_1 = arith.constant 0 : i32
    return %c0_i32, %c0_i32_0 : i32, i32
  }
  func.func @transform_7(%arg0: i32) -> (i32, i32) {
    %c0_i32 = arith.constant 0 : i32
    %c0_i32_0 = arith.constant 0 : i32
    %c0_i32_1 = arith.constant 0 : i32
    return %c0_i32, %c0_i32_0 : i32, i32
  }
}

</mosaic_0001>

<bundles_post_ra>
// kernel: tpu_custom_call.1
= control target key start
LH: loop header
LB: loop body
LE: loop exit
PB: predicated region body
PF: predicated region fallthrough
CT: control target
= control target key end

     0   :  { %12 = vsyncpa [#allocation3], 0  ;;  %s3388_s0 = inlined_call_operand.hbm [shape: bf16[256,128], index: 0, kind: input, shape index: {}]   ;;  %s3389_s1 = inlined_call_operand.hbm [shape: bf16[256,256], index: 1, kind: input, shape index: {}]   ;;  %s3390_s2 = inlined_call_operand.hbm [shape: bf16[128,128], index: 2, kind: input, shape index: {}]   ;;  %s3391_s3 = inlined_call_operand.vmem [shape: f32[1,128], index: 3, kind: input, shape index: {}]   ;;  %s3392_s4 = inlined_call_operand.hbm [shape: bf16[128,128], index: 4, kind: input, shape index: {}]   ;;  %s3393_s5 = inlined_call_operand.vmem [shape: f32[1,128], index: 5, kind: input, shape index: {}]   ;;  %s3394_s6 = inlined_call_operand.hbm [shape: bf16[256,128], index: 6, kind: input, shape index: {}]   ;;  %s3395_s7 = inlined_call_operand.hbm [shape: f32[256,128], index: 7, kind: output, shape index: {}]  }
   0x1   :  { %13 = vsyncpa [#allocation6], 0 }
   0x2   :  { %14 = vsyncpa [#allocation9], 0 }
   0x3   :  { %15 = vsyncpa [#allocation4], 0  ;;  %s2643_s24 = smov [#allocation5]  }
   0x4   :  { %s33_s25 = sshll.u32 %s2643_s24, 4  ;;  %s34_s25 = int_to_ptr.vmem [resolvable:$true] %s33_s25 }
   0x5   :  { %s2523_s26 = scalar_lea.vmem %s34_s25, 4096  ;;  %p2528_p1 = scmp.lt.s32.totalorder %s34_s25, %s34_s25 }
   0x6   :  { %p2524_p0 = scmp.ne.s32.totalorder %s34_s25, %s2523_s26  ;;  %p2529_p2 = scmp.lt.s32.totalorder %s2523_s26, %s2523_s26 }
   0x8   :  { %p2530_p3 = por %p2529_p2, %p2528_p1 }
   0xa   :  { %p2531_p4 = pnand %p2530_p3, %p2524_p0 }
   0xc   :  { %2534 = shalt.err (!%p2531_p4)
}
   0xd   :  { %s2644_s27 = smov 128   ;;  %s2645_s28 = smov 8  }
   0xe   :  { %39 = dma.hbm_to_vmem [thread:$0]  %s3389_s1, 4096, %s34_s25, [#allocation6], %s2644_s27, %s2644_s27, %s2645_s28  }
   0xf   :  { %s2646_s8 = smov [#allocation8]   ;;  %s2647_s10 = smov [#allocation2]  }
  0x10   :  { %s59_s9 = sshll.u32 %s2646_s8, 4  ;;  %s21_s11 = sshll.u32 %s2647_s10, 4  ;;  %s60_s9 = int_to_ptr.vmem [resolvable:$true] %s59_s9  ;;  %s22_s11 = int_to_ptr.vmem [resolvable:$true] %s21_s11 }
  0x11   :  { %s2543_s12 = scalar_lea.vmem %s60_s9, 1024  ;;  %p2548_p6 = scmp.lt.s32.totalorder %s60_s9, %s60_s9 }
  0x12   :  { %p2544_p5 = scmp.ne.s32.totalorder %s60_s9, %s2543_s12  ;;  %p2549_p7 = scmp.lt.s32.totalorder %s2543_s12, %s2543_s12 }
  0x14   :  { %p2550_p8 = por %p2549_p7, %p2548_p6 }
  0x16   :  { %p2551_p9 = pnand %p2550_p8, %p2544_p5 }
  0x18   :  { %2554 = shalt.err (!%p2551_p9)
}
  0x19   :  { %s2648_s13 = smov 64   ;;  %s2649_s14 = smov 4  }
  0x1a   :  { %65 = dma.hbm_to_vmem [thread:$0]  %s3392_s4, 1024, %s60_s9, [#allocation9], %s2648_s13, %s2648_s13, %s2649_s14  }
  0x1b   :  { %s2563_s1 = scalar_lea.vmem %s22_s11, 2048  ;;  %p2568_p11 = scmp.lt.s32.totalorder %s22_s11, %s22_s11 }
  0x1c   :  { %p2564_p10 = scmp.ne.s32.totalorder %s22_s11, %s2563_s1  ;;  %p2569_p12 = scmp.lt.s32.totalorder %s2563_s1, %s2563_s1 }
  0x1e   :  { %p2570_p13 = por %p2569_p12, %p2568_p11 }
  0x20   :  { %p2571_p0 = pnand %p2570_p13, %p2564_p10 }
  0x22   :  { %2574 = shalt.err (!%p2571_p0)
}
  0x23   :  { %27 = dma.hbm_to_vmem [thread:$0]  %s3388_s0, 2048, %s22_s11, [#allocation3], %s2648_s13, %s2648_s13, %s2649_s14  }
  0x24   :  { %s2650_s19 = smov [#allocation7]   ;;  %s2651_s21 = smov [#allocation10]  }
  0x25   :  { %s45_s20 = sshll.u32 %s2650_s19, 4  ;;  %s73_s4 = sshll.u32 %s2651_s21, 4  ;;  %s46_s20 = int_to_ptr.vmem [resolvable:$true] %s45_s20  ;;  %s74_s4 = int_to_ptr.vmem [resolvable:$true] %s73_s4 }
  0x26   :  { %s2583_s22 = scalar_lea.vmem %s46_s20, 1024  ;;  %p2588_p2 = scmp.lt.s32.totalorder %s46_s20, %s46_s20 }
  0x27   :  { %p2584_p1 = scmp.ne.s32.totalorder %s46_s20, %s2583_s22  ;;  %p2589_p3 = scmp.lt.s32.totalorder %s2583_s22, %s2583_s22 }
  0x29   :  { %p2590_p4 = por %p2589_p3, %p2588_p2 }
  0x2b   :  { %p2591_p5 = pnand %p2590_p4, %p2584_p1 }
  0x2d   :  { %2594 = shalt.err (!%p2591_p5)
}
  0x2e   :  { %51 = dma.hbm_to_vmem [thread:$0]  %s3390_s2, 1024, %s46_s20, [#allocation6], %s2648_s13, %s2648_s13, %s2649_s14  }
  0x2f   :  { %s2603_s0 = scalar_lea.vmem %s74_s4, 2048  ;;  %p2608_p7 = scmp.lt.s32.totalorder %s74_s4, %s74_s4 }
  0x30   :  { %p2604_p6 = scmp.ne.s32.totalorder %s74_s4, %s2603_s0  ;;  %p2609_p8 = scmp.lt.s32.totalorder %s2603_s0, %s2603_s0 }
  0x32   :  { %p2610_p9 = por %p2609_p8, %p2608_p7 }
  0x34   :  { %p2611_p10 = pnand %p2610_p9, %p2604_p6 }
  0x36   :  { %2614 = shalt.err (!%p2611_p10)
}
  0x37   :  { %79 = dma.hbm_to_vmem [thread:$0]  %s3394_s6, 2048, %s74_s4, [#allocation9], %s2648_s13, %s2648_s13, %s2649_s14  }
  0x38   :  { %2635 = dma.done.wait [#allocation3], 2048  }
  0x39   :  { %2636 = vsyncadd [#allocation3], 4294965248 }
  0x3a   :  { %2637 = dma.done.wait [#allocation6], 5120  }
  0x3b   :  { %2638 = vsyncadd [#allocation6], 4294962176 }
  0x3c   :  { %2639 = dma.done.wait [#allocation9], 3072  }
  0x3d   :  { %2640 = vsyncadd [#allocation9], 4294964224  ;;  %v2307_v0 = vld [vmem:[#allocation7 + $0x38] sm:$0xff]   ;;  %v2308_v1 = vld [vmem:[#allocation7 + $0x30] sm:$0xff]  }
  0x3e   :  { %2201 = vmatprep.subr.bf16.mxu0 %v2307_v0  ;;  %v2309_v2 = vld [vmem:[#allocation7 + $0x28] sm:$0xff]   ;;  %v2310_v3 = vld [vmem:[#allocation7 + $0x20] sm:$0xff]   ;;  %v2311_v5 = vld [vmem:[#allocation7 + $0x18] sm:$0xff]  }
  0x3f   :  { %2202 = vmatpush3.bf16.msra.mxu0 %v2307_v0  ;;  %v2315_v4 = vld [vmem:[#allocation2] sm:$0xff]   ;;  %v2312_v6 = vld [vmem:[#allocation7 + $0x10] sm:$0xff]   ;;  %v2313_v7 = vld [vmem:[#allocation7 + $0x8] sm:$0xff]  }
  0x40   :  { %2203 = vmatprep.subr.bf16.mxu0 %v2308_v1  ;;  %2217 = vmatprep.mubr.bf16.mxu0 %v2315_v4  ;;  %v2314_v8 = vld [vmem:[#allocation7] sm:$0xff]   ;;  %v2316_v9 = vld [vmem:[#allocation2 + $0x8] sm:$0xff]   ;;  %v2317_v10 = vld [vmem:[#allocation2 + $0x10] sm:$0xff]  }
  0x41   :  { %v2318_v11 = vld [vmem:[#allocation2 + $0x18] sm:$0xff]   ;;  %v2319_v12 = vld [vmem:[#allocation2 + $0x20] sm:$0xff]   ;;  %v2320_v13 = vld [vmem:[#allocation2 + $0x28] sm:$0xff]  }
  0x42   :  { %v2321_v14 = vld [vmem:[#allocation2 + $0x30] sm:$0xff]   ;;  %v2322_v15 = vld [vmem:[#allocation2 + $0x38] sm:$0xff]   ;;  %v2323_v16 = vld [vmem:[#allocation2 + $0x40] sm:$0xff]  }
  0x43   :  { %2204 = vmatpush3.bf16.msra.mxu0 %v2308_v1  ;;  %v2324_v17 = vld [vmem:[#allocation2 + $0x48] sm:$0xff]   ;;  %v2325_v18 = vld [vmem:[#allocation2 + $0x50] sm:$0xff]   ;;  %v2326_v19 = vld [vmem:[#allocation2 + $0x58] sm:$0xff]  }
  0x44   :  { %2205 = vmatprep.subr.bf16.mxu0 %v2309_v2  ;;  %v2327_v20 = vld [vmem:[#allocation2 + $0x60] sm:$0xff]   ;;  %v2328_v21 = vld [vmem:[#allocation2 + $0x68] sm:$0xff]   ;;  %v2329_v22 = vld [vmem:[#allocation2 + $0x70] sm:$0xff]  }
  0x45   :  { %v2330_v23 = vld [vmem:[#allocation2 + $0x78] sm:$0xff]   ;;  %v2333_v24 = vld [vmem:[#allocation5 + $0x4] ss:$8 sps:$4 sm:$0xff]   ;;  %v2726_v26 = vld [vmem:[%s3391_s3] ss:$0 sm:$0xff] }
  0x46   :  { %696 = vmatprep.mubr.bf16.mxu1 %v2333_v24 }
  0x47   :  { %2206 = vmatpush3.bf16.msra.mxu0 %v2309_v2 }
  0x48   :  { %2207 = vmatprep.subr.bf16.mxu0 %v2310_v3 }
  0x4b   :  { %2208 = vmatpush3.bf16.msra.mxu0 %v2310_v3 }
  0x4c   :  { %2209 = vmatprep.subr.bf16.mxu0 %v2311_v5 }
  0x4f   :  { %2210 = vmatpush3.bf16.msra.mxu0 %v2311_v5 }
  0x50   :  { %2211 = vmatprep.subr.bf16.mxu0 %v2312_v6 }
  0x53   :  { %2212 = vmatpush3.bf16.msra.mxu0 %v2312_v6 }
  0x54   :  { %2213 = vmatprep.subr.bf16.mxu0 %v2313_v7 }
  0x57   :  { %2214 = vmatpush3.bf16.msra.mxu0 %v2313_v7 }
  0x58   :  { %2215 = vmatprep.subr.bf16.mxu0 %v2314_v8 }
  0x5b   :  { %2216 = vmatpush3.bf16.msra.mxu0 %v2314_v8 }
  0x5e   :  { %2218 = vmatmul.mubr.bf16.vlgmr.msra.gmra.mxu0 %v2316_v9 }
  0x5f   :  { %2221 = vmatprep.mubr.bf16.mxu0 %v2317_v10 }
  0x66   :  { %2222 = vmatmul.mubr.bf16.gmra.mxu0 %v2318_v11 }
  0x67   :  { %2225 = vmatprep.mubr.bf16.mxu0 %v2319_v12 }
  0x6e   :  { %2226 = vmatmul.mubr.bf16.gmra.mxu0 %v2320_v13 }
  0x6f   :  { %2229 = vmatprep.mubr.bf16.mxu0 %v2321_v14 }
  0x76   :  { %2230 = vmatmul.mubr.bf16.gmra.mxu0 %v2322_v15 }
  0x77   :  { %2233 = vmatprep.mubr.bf16.mxu0 %v2323_v16 }
  0x7e   :  { %2234 = vmatmul.mubr.bf16.gmra.mxu0 %v2324_v17 }
  0x7f   :  { %2237 = vmatprep.mubr.bf16.mxu0 %v2325_v18 }
  0x86   :  { %2238 = vmatmul.mubr.bf16.gmra.mxu0 %v2326_v19 }
  0x87   :  { %2241 = vmatprep.mubr.bf16.mxu0 %v2327_v20 }
  0x8e   :  { %2242 = vmatmul.mubr.bf16.gmra.mxu0 %v2328_v21 }
  0x8f   :  { %2245 = vmatprep.mubr.bf16.mxu0 %v2329_v22 }
  0x96   :  { %2246 = vmatmul.mubr.bf16.gmra.mxu0 %v2330_v23 }
  0x97   :  { %1001 = vmatprep.mubr.bf16.mxu0 %v2333_v24 }
 0x11e   :  { %v2219_v25 = vpop.f32.mrf.mxu0 }
 0x11f   :  { %v2729_v29 = vadd.f32 %v2219_v25, %v2726_v26 }
 0x120   :  { %v329_v27 = vpop.f32.mrf.mxu0 }
 0x121   :  { %v2735_v32 = vadd.f32 %v2726_v26, %v329_v27 }
 0x122   :  { %v2220_v28 = vpop.f32.mrf.mxu0 }
 0x123   :  { %v2732_v30 = vadd.f32 %v2220_v28, %v2726_v26 }
 0x124   :  { %v332_v31 = vpop.f32.mrf.mxu0 }
 0x125   :  { %v489_v33 = vpack.c.bf16 %v2732_v30, %v2729_v29  ;;  %v2740_v34 = vadd.f32 %v2726_v26, %v332_v31  ;;  %v2808_v29 = vld [vmem:[#allocation5 + $0x20] ss:$8 sps:$4 sm:$0xff]   ;;  %v2810_v30 = vld [vmem:[#allocation5 + $0x34] ss:$8 sps:$4 sm:$0xff]  }
 0x126   :  { %v2223_v35 = vpop.f32.mrf.mxu0  ;;  %3432 = vst [vmem:[#allocation20_spill] sm:$0xff] %v2808_v29  ;;  %3433 = vst [vmem:[#allocation21_spill] sm:$0xff] %v2810_v30 }
 0x127   :  { %v488_v36 = vpack.c.bf16 %v2740_v34, %v2735_v32  ;;  %v2745_v39 = vadd.f32 %v2223_v35, %v2726_v26  ;;  %v2814_v32 = vld [vmem:[#allocation5 + $0x30] ss:$8 sps:$4 sm:$0xff]   ;;  %v2820_v34 = vld [vmem:[#allocation5 + $0x40] ss:$8 sps:$4 sm:$0xff]  }
 0x128   :  { %v345_v37 = vpop.f32.mrf.mxu0  ;;  %3434 = vst [vmem:[#allocation22_spill] sm:$0xff] %v2814_v32  ;;  %3436 = vst [vmem:[#allocation24_spill] sm:$0xff] %v2820_v34 }
 0x129   :  { %v2751_v42 = vadd.f32 %v2726_v26, %v345_v37 }
 0x12a   :  { %v2224_v38 = vpop.f32.mrf.mxu0 }
 0x12b   :  { %v2748_v40 = vadd.f32 %v2224_v38, %v2726_v26 }
 0x12c   :  { %v348_v41 = vpop.f32.mrf.mxu0 }
 0x12d   :  { %v491_v43 = vpack.c.bf16 %v2748_v40, %v2745_v39  ;;  %v2756_v44 = vadd.f32 %v2726_v26, %v348_v41  ;;  %v2793_v39 = vld [vmem:[#allocation5] ss:$8 sps:$4 sm:$0xff]   ;;  %v2798_v40 = vld [vmem:[#allocation5 + $0x14] ss:$8 sps:$4 sm:$0xff]  }
 0x12e   :  { %v2227_v45 = vpop.f32.mrf.mxu0  ;;  %3428 = vst [vmem:[#allocation16_spill] sm:$0xff] %v2793_v39  ;;  %3429 = vst [vmem:[#allocation17_spill] sm:$0xff] %v2798_v40 }
 0x12f   :  { %v490_v46 = vpack.c.bf16 %v2756_v44, %v2751_v42  ;;  %v370_v23 = vadd.f32 %v2227_v45, %v2726_v26  ;;  %v2804_v42 = vld [vmem:[#allocation5 + $0x24] ss:$8 sps:$4 sm:$0xff]  }
 0x130   :  { %v361_v47 = vpop.f32.mrf.mxu0  ;;  %3431 = vst [vmem:[#allocation19_spill] sm:$0xff] %v2804_v42  ;;  %v2828_v44 = vld [vmem:[#allocation5 + $0x64] ss:$8 sps:$4 sm:$0xff]  }
 0x131   :  { %v362_v35 = vadd.f32 %v2726_v26, %v361_v47  ;;  %3439 = vst [vmem:[#allocation27_spill] sm:$0xff] %v2828_v44 }
 0x132   :  { %v2228_v48 = vpop.f32.mrf.mxu0 }
 0x133   :  { %v373_v19 = vadd.f32 %v2228_v48, %v2726_v26 }
 0x134   :  { %v364_v49 = vpop.f32.mrf.mxu0 }
 0x135   :  { %v493_v25 = vpack.c.bf16 %v373_v19, %v370_v23  ;;  %v365_v27 = vadd.f32 %v2726_v26, %v364_v49 }
 0x136   :  { %v2231_v50 = vpop.f32.mrf.mxu0 }
 0x137   :  { %v386_v8 = vadd.f32 %v2231_v50, %v2726_v26  ;;  %v492_v38 = vpack.c.bf16 %v365_v27, %v362_v35 }
 0x138   :  { %v377_v51 = vpop.f32.mrf.mxu0 }
 0x139   :  { %v378_v17 = vadd.f32 %v2726_v26, %v377_v51 }
 0x13a   :  { %v2232_v52 = vpop.f32.mrf.mxu0 }
 0x13b   :  { %v389_v4 = vadd.f32 %v2232_v52, %v2726_v26 }
 0x13c   :  { %v380_v53 = vpop.f32.mrf.mxu0 }
 0x13d   :  { %v381_v13 = vadd.f32 %v2726_v26, %v380_v53  ;;  %v495_v14 = vpack.c.bf16 %v389_v4, %v386_v8  ;;  %v2874_v4 = vld [vmem:[#allocation5 + $0xd0] ss:$8 sps:$4 sm:$0xff]  }
 0x13e   :  { %v2235_v54 = vpop.f32.mrf.mxu0  ;;  %3454 = vst [vmem:[#allocation42_spill] sm:$0xff] %v2874_v4  ;;  %v2886_v8 = vld [vmem:[#allocation5 + $0xf0] ss:$8 sps:$4 sm:$0xff]  }
 0x13f   :  { %v494_v20 = vpack.c.bf16 %v381_v13, %v378_v17  ;;  %v402_v47 = vadd.f32 %v2235_v54, %v2726_v26  ;;  %v2834_v54 = vld [vmem:[#allocation5 + $0x74] ss:$8 sps:$4 sm:$0xff]   ;;  %3458 = vst [vmem:[#allocation46_spill] sm:$0xff] %v2886_v8 }
 0x140   :  { %v393_v55 = vpop.f32.mrf.mxu0  ;;  %3441 = vst [vmem:[#allocation29_spill] sm:$0xff] %v2834_v54 }
 0x141   :  { %v394_v53 = vadd.f32 %v2726_v26, %v393_v55  ;;  %v2838_v55 = vld [vmem:[#allocation5 + $0x70] ss:$8 sps:$4 sm:$0xff]  }
 0x142   :  { %v2236_v56 = vpop.f32.mrf.mxu0  ;;  %3442 = vst [vmem:[#allocation30_spill] sm:$0xff] %v2838_v55 }
 0x143   :  { %v405_v50 = vadd.f32 %v2236_v56, %v2726_v26  ;;  %v2840_v56 = vld [vmem:[#allocation5 + $0x84] ss:$8 sps:$4 sm:$0xff]  }
 0x144   :  { %v396_v57 = vpop.f32.mrf.mxu0  ;;  %3443 = vst [vmem:[#allocation31_spill] sm:$0xff] %v2840_v56 }
 0x145   :  { %v497_v51 = vpack.c.bf16 %v405_v50, %v402_v47  ;;  %v397_v52 = vadd.f32 %v2726_v26, %v396_v57  ;;  %v2844_v57 = vld [vmem:[#allocation5 + $0x80] ss:$8 sps:$4 sm:$0xff]  }
 0x146   :  { %v2239_v58 = vpop.f32.mrf.mxu0  ;;  %3444 = vst [vmem:[#allocation32_spill] sm:$0xff] %v2844_v57 }
 0x147   :  { %v418_v37 = vadd.f32 %v2239_v58, %v2726_v26  ;;  %v496_v58 = vpack.c.bf16 %v397_v52, %v394_v53  ;;  %v1915_v52 = vld [vmem:[#allocation10 + $0x10] sm:$0xff]  }
 0x148   :  { %v409_v59 = vpop.f32.mrf.mxu0 }
 0x149   :  { %v410_v48 = vadd.f32 %v2726_v26, %v409_v59  ;;  %v2846_v59 = vld [vmem:[#allocation5 + $0x94] ss:$8 sps:$4 sm:$0xff]  }
 0x14a   :  { %v2240_v60 = vpop.f32.mrf.mxu0  ;;  %3445 = vst [vmem:[#allocation33_spill] sm:$0xff] %v2846_v59 }
 0x14b   :  { %v421_v28 = vadd.f32 %v2240_v60, %v2726_v26  ;;  %v2850_v60 = vld [vmem:[#allocation5 + $0x90] ss:$8 sps:$4 sm:$0xff]  }
 0x14c   :  { %v412_v61 = vpop.f32.mrf.mxu0  ;;  %3446 = vst [vmem:[#allocation34_spill] sm:$0xff] %v2850_v60 }
 0x14d   :  { %v499_v41 = vpack.c.bf16 %v421_v28, %v418_v37  ;;  %v413_v45 = vadd.f32 %v2726_v26, %v412_v61  ;;  %v2852_v61 = vld [vmem:[#allocation5 + $0xa4] ss:$8 sps:$4 sm:$0xff]  }
 0x14e   :  { %v2243_v62 = vpop.f32.mrf.mxu0  ;;  %3447 = vst [vmem:[#allocation35_spill] sm:$0xff] %v2852_v61 }
 0x14f   :  { %v434_v18 = vadd.f32 %v2243_v62, %v2726_v26  ;;  %v498_v49 = vpack.c.bf16 %v413_v45, %v410_v48  ;;  %v2856_v62 = vld [vmem:[#allocation5 + $0xa0] ss:$8 sps:$4 sm:$0xff]  }
 0x150   :  { %v425_v63 = vpop.f32.mrf.mxu0  ;;  %3448 = vst [vmem:[#allocation36_spill] sm:$0xff] %v2856_v62 }
 0x151   :  { %v426_v24 = vadd.f32 %v2726_v26, %v425_v63  ;;  %v2858_v63 = vld [vmem:[#allocation5 + $0xb4] ss:$8 sps:$4 sm:$0xff]  }
 0x152   :  { %v2244_v0 = vpop.f32.mrf.mxu0  ;;  %3449 = vst [vmem:[#allocation37_spill] sm:$0xff] %v2858_v63 }
 0x153   :  { %v437_v15 = vadd.f32 %v2244_v0, %v2726_v26  ;;  %v2862_v0 = vld [vmem:[#allocation5 + $0xb0] ss:$8 sps:$4 sm:$0xff]  }
 0x154   :  { %v428_v1 = vpop.f32.mrf.mxu0  ;;  %3450 = vst [vmem:[#allocation38_spill] sm:$0xff] %v2862_v0 }
 0x155   :  { %v501_v21 = vpack.c.bf16 %v437_v15, %v434_v18  ;;  %v429_v22 = vadd.f32 %v2726_v26, %v428_v1  ;;  %v2864_v1 = vld [vmem:[#allocation5 + $0xc4] ss:$8 sps:$4 sm:$0xff]  }
 0x156   :  { %v2247_v2 = vpop.f32.mrf.mxu0  ;;  %3451 = vst [vmem:[#allocation39_spill] sm:$0xff] %v2864_v1 }
 0x157   :  { %v450_v6 = vadd.f32 %v2247_v2, %v2726_v26  ;;  %v500_v31 = vpack.c.bf16 %v429_v22, %v426_v24  ;;  %v2868_v2 = vld [vmem:[#allocation5 + $0xc0] ss:$8 sps:$4 sm:$0xff]  }
 0x158   :  { %v441_v3 = vpop.f32.mrf.mxu0  ;;  %3452 = vst [vmem:[#allocation40_spill] sm:$0xff] %v2868_v2 }
 0x159   :  { %v442_v10 = vadd.f32 %v2726_v26, %v441_v3  ;;  %v2870_v3 = vld [vmem:[#allocation5 + $0xd4] ss:$8 sps:$4 sm:$0xff]  }
 0x15a   :  { %v2248_v5 = vpop.f32.mrf.mxu0  ;;  %3453 = vst [vmem:[#allocation41_spill] sm:$0xff] %v2870_v3 }
 0x15b   :  { %v453_v7 = vadd.f32 %v2248_v5, %v2726_v26  ;;  %v2876_v5 = vld [vmem:[#allocation5 + $0xe4] ss:$8 sps:$4 sm:$0xff]  }
 0x15c   :  { %v444_v9 = vpop.f32.mrf.mxu0  ;;  %3455 = vst [vmem:[#allocation43_spill] sm:$0xff] %v2876_v5 }
 0x15d   :  { %v445_v11 = vadd.f32 %v2726_v26, %v444_v9  ;;  %v503_v12 = vpack.c.bf16 %v453_v7, %v450_v6  ;;  %v2802_v26 = vld [vmem:[#allocation5 + $0x10] ss:$8 sps:$4 sm:$0xff]   ;;  %v2880_v6 = vld [vmem:[#allocation5 + $0xe0] ss:$8 sps:$4 sm:$0xff]   ;;  %v2882_v7 = vld [vmem:[#allocation5 + $0xf4] ss:$8 sps:$4 sm:$0xff]  }
 0x15e   :  { %3430 = vst [vmem:[#allocation18_spill] sm:$0xff] %v2802_v26  ;;  %3456 = vst [vmem:[#allocation44_spill] sm:$0xff] %v2880_v6 }
 0x15f   :  { %v502_v16 = vpack.c.bf16 %v445_v11, %v442_v10  ;;  %1953 = vmatprep.subr.bf16.mxu1 %v503_v12  ;;  %3457 = vst [vmem:[#allocation45_spill] sm:$0xff] %v2882_v7  ;;  %v1851_v12 = vld [vmem:[#allocation10] sm:$0xff]  }
 0x160   :  { %1954 = vmatpush3.bf16.msra.mxu1 %v495_v14  ;;  %v1853_v18 = vunpack.c.h.bf16 %v1851_v12 }
 0x161   :  { %1955 = vmatprep.subr.bf16.mxu1 %v502_v16  ;;  %v1852_v16 = vunpack.c.l.bf16 %v1851_v12 }
 0x164   :  { %1956 = vmatpush3.bf16.msra.mxu1 %v494_v20 }
 0x165   :  { %1957 = vmatprep.subr.bf16.mxu1 %v501_v21 }
 0x168   :  { %1958 = vmatpush3.bf16.msra.mxu1 %v493_v25  ;;  %v1914_v25 = vld [vmem:[#allocation10 + $0x8] sm:$0xff]  }
 0x169   :  { %1959 = vmatprep.subr.bf16.mxu1 %v500_v31  ;;  %v1856_v37 = vunpack.c.l.bf16 %v1914_v25 }
 0x16c   :  { %1960 = vmatpush3.bf16.msra.mxu1 %v492_v38 }
 0x16d   :  { %1961 = vmatprep.subr.bf16.mxu1 %v499_v41  ;;  %v1857_v41 = vunpack.c.h.bf16 %v1914_v25 }
 0x170   :  { %1962 = vmatpush3.bf16.msra.mxu1 %v491_v43  ;;  %v2826_v43 = vld [vmem:[#allocation5 + $0x50] ss:$8 sps:$4 sm:$0xff]  }
 0x171   :  { %1963 = vmatprep.subr.bf16.mxu1 %v498_v49  ;;  %3438 = vst [vmem:[#allocation26_spill] sm:$0xff] %v2826_v43 }
 0x174   :  { %1964 = vmatpush3.bf16.msra.mxu1 %v490_v46  ;;  %v2832_v46 = vld [vmem:[#allocation5 + $0x60] ss:$8 sps:$4 sm:$0xff]  }
 0x175   :  { %1965 = vmatprep.subr.bf16.mxu1 %v497_v51  ;;  %3440 = vst [vmem:[#allocation28_spill] sm:$0xff] %v2832_v46 }
 0x178   :  { %1966 = vmatpush3.bf16.msra.mxu1 %v489_v33  ;;  %v2816_v33 = vld [vmem:[#allocation5 + $0x44] ss:$8 sps:$4 sm:$0xff]  }
 0x179   :  { %1967 = vmatprep.subr.bf16.mxu1 %v496_v58  ;;  %3435 = vst [vmem:[#allocation23_spill] sm:$0xff] %v2816_v33 }
 0x17c   :  { %1968 = vmatpush3.bf16.msra.mxu1 %v488_v36  ;;  %v2822_v36 = vld [vmem:[#allocation5 + $0x54] ss:$8 sps:$4 sm:$0xff]  }
 0x17d   :  { %3437 = vst [vmem:[#allocation25_spill] sm:$0xff] %v2822_v36 }
 0x17f   :  { %697 = vmatmul.mubr.bf16.vlgmr.msra.gmra.mxu1 %v2793_v39  ;;  %v1925_v39 = vld [vmem:[#allocation10 + $0x60] sm:$0xff]  }
 0x180   :  { %704 = vmatprep.mubr.bf16.mxu1 %v2798_v40 }
 0x187   :  { %705 = vmatmul.mubr.bf16.gmra.mxu1 %v2802_v26 }
 0x188   :  { %712 = vmatprep.mubr.bf16.mxu1 %v2804_v42 }
 0x18f   :  { %713 = vmatmul.mubr.bf16.gmra.mxu1 %v2808_v29 }
 0x190   :  { %720 = vmatprep.mubr.bf16.mxu1 %v2810_v30 }
 0x197   :  { %721 = vmatmul.mubr.bf16.gmra.mxu1 %v2814_v32  ;;  %v1926_v32 = vld [vmem:[#allocation10 + $0x68] sm:$0xff]  }
 0x198   :  { %728 = vmatprep.mubr.bf16.mxu1 %v2816_v33 }
 0x19f   :  { %729 = vmatmul.mubr.bf16.gmra.mxu1 %v2820_v34 }
 0x1a0   :  { %736 = vmatprep.mubr.bf16.mxu1 %v2822_v36 }
 0x1a7   :  { %737 = vmatmul.mubr.bf16.gmra.mxu1 %v2826_v43 }
 0x1a8   :  { %744 = vmatprep.mubr.bf16.mxu1 %v2828_v44 }
 0x1af   :  { %745 = vmatmul.mubr.bf16.gmra.mxu1 %v2832_v46 }
 0x1b0   :  { %752 = vmatprep.mubr.bf16.mxu1 %v2834_v54 }
 0x1b7   :  { %753 = vmatmul.mubr.bf16.gmra.mxu1 %v2838_v55 }
 0x1b8   :  { %760 = vmatprep.mubr.bf16.mxu1 %v2840_v56 }
 0x1bf   :  { %761 = vmatmul.mubr.bf16.gmra.mxu1 %v2844_v57  ;;  %v1927_v57 = vld [vmem:[#allocation10 + $0x70] sm:$0xff]  }
 0x1c0   :  { %768 = vmatprep.mubr.bf16.mxu1 %v2846_v59  ;;  %v1909_v56 = vunpack.c.h.bf16 %v1927_v57  ;;  %v1908_v29 = vunpack.c.l.bf16 %v1927_v57 }
 0x1c7   :  { %769 = vmatmul.mubr.bf16.gmra.mxu1 %v2850_v60 }
 0x1c8   :  { %776 = vmatprep.mubr.bf16.mxu1 %v2852_v61  ;;  %v1928_v61 = vld [vmem:[#allocation10 + $0x78] sm:$0xff]  }
 0x1c9   :  { %v1912_v55 = vunpack.c.l.bf16 %v1928_v61  ;;  %v1913_v46 = vunpack.c.h.bf16 %v1928_v61 }
 0x1cf   :  { %777 = vmatmul.mubr.bf16.gmra.mxu1 %v2856_v62 }
 0x1d0   :  { %784 = vmatprep.mubr.bf16.mxu1 %v2858_v63 }
 0x1d7   :  { %785 = vmatmul.mubr.bf16.gmra.mxu1 %v2862_v0 }
 0x1d8   :  { %792 = vmatprep.mubr.bf16.mxu1 %v2864_v1 }
 0x1df   :  { %793 = vmatmul.mubr.bf16.gmra.mxu1 %v2868_v2 }
 0x1e0   :  { %800 = vmatprep.mubr.bf16.mxu1 %v2870_v3 }
 0x1e7   :  { %801 = vmatmul.mubr.bf16.gmra.mxu1 %v2874_v4 }
 0x1e8   :  { %808 = vmatprep.mubr.bf16.mxu1 %v2876_v5 }
 0x1ef   :  { %809 = vmatmul.mubr.bf16.gmra.mxu1 %v2880_v6 }
 0x1f0   :  { %816 = vmatprep.mubr.bf16.mxu1 %v2882_v7 }
 0x1f7   :  { %817 = vmatmul.mubr.bf16.gmra.mxu1 %v2886_v8 }
 0x23f   :  { %v1969_v9 = vpop.f32.mrf.mxu1 }
 0x241   :  { %v1970_v10 = vpop.f32.mrf.mxu1 }
 0x242   :  { %v1971_v11 = vadd.f32 %v1970_v10, %v1969_v9 }
 0x243   :  { %v1972_v13 = vpop.f32.mrf.mxu1 }
 0x244   :  { %v825_v15 = vmax.f32 %v1971_v11, 0.0  ;;  %v1860_v11 = vunpack.c.l.bf16 %v1915_v52 }
 0x245   :  { %v1973_v14 = vpop.f32.mrf.mxu1 }
 0x246   :  { %v1974_v17 = vadd.f32 %v1973_v14, %v1972_v13  ;;  %v2889_v22 = vmul.f32 %v1852_v16, %v825_v15  ;;  %v1861_v13 = vunpack.c.h.bf16 %v1915_v52  ;;  %v1917_v52 = vld [vmem:[#allocation10 + $0x20] sm:$0xff]  }
 0x247   :  { %v1975_v19 = vpop.f32.mrf.mxu1 }
 0x248   :  { %v826_v20 = vmax.f32 %v1974_v17, 0.0  ;;  %3459 = vst [vmem:[#allocation47_spill] sm:$0xff] %v2889_v22 }
 0x249   :  { %v1976_v21 = vpop.f32.mrf.mxu1 }
 0x24a   :  { %v2891_v23 = vmul.f32 %v1853_v18, %v826_v20  ;;  %v1977_v24 = vadd.f32 %v1976_v21, %v1975_v19  ;;  %v1916_v20 = vld [vmem:[#allocation10 + $0x18] sm:$0xff]  }
 0x24b   :  { %v1978_v27 = vpop.f32.mrf.mxu1 }
 0x24c   :  { %v827_v35 = vmax.f32 %v1977_v24, 0.0 }
 0x24d   :  { %v1979_v31 = vpop.f32.mrf.mxu1 }
 0x24e   :  { %v1980_v38 = vadd.f32 %v1979_v31, %v1978_v27  ;;  %v2895_v49 = vmul.f32 %v1856_v37, %v827_v35  ;;  %v1864_v31 = vunpack.c.l.bf16 %v1916_v20  ;;  %v1865_v37 = vunpack.c.h.bf16 %v1916_v20 }
 0x24f   :  { %v1981_v45 = vpop.f32.mrf.mxu1 }
 0x250   :  { %v828_v48 = vmax.f32 %v1980_v38, 0.0 }
 0x251   :  { %v1982_v50 = vpop.f32.mrf.mxu1 }
 0x252   :  { %v2897_v47 = vmul.f32 %v1857_v41, %v828_v48  ;;  %v1983_v51 = vadd.f32 %v1982_v50, %v1981_v45 }
 0x253   :  { %v1984_v53 = vpop.f32.mrf.mxu1 }
 0x254   :  { %v829_v10 = vmax.f32 %v1983_v51, 0.0 }
 0x255   :  { %v1985_v9 = vpop.f32.mrf.mxu1 }
 0x256   :  { %v1986_v12 = vadd.f32 %v1985_v9, %v1984_v53  ;;  %v2901_v17 = vmul.f32 %v1860_v11, %v829_v10 }
 0x257   :  { %v1987_v14 = vpop.f32.mrf.mxu1 }
 0x258   :  { %v830_v15 = vmax.f32 %v1986_v12, 0.0  ;;  %v1868_v12 = vunpack.c.l.bf16 %v1917_v52 }
 0x259   :  { %v1988_v16 = vpop.f32.mrf.mxu1 }
 0x25a   :  { %v2903_v18 = vmul.f32 %v1861_v13, %v830_v15  ;;  %v1989_v19 = vadd.f32 %v1988_v16, %v1987_v14  ;;  %v1869_v14 = vunpack.c.h.bf16 %v1917_v52 }
 0x25b   :  { %v1990_v21 = vpop.f32.mrf.mxu1 }
 0x25c   :  { %v831_v27 = vmax.f32 %v1989_v19, 0.0 }
 0x25d   :  { %v1991_v25 = vpop.f32.mrf.mxu1 }
 0x25e   :  { %v1992_v35 = vadd.f32 %v1991_v25, %v1990_v21  ;;  %v2907_v48 = vmul.f32 %v1864_v31, %v831_v27  ;;  %v1918_v27 = vld [vmem:[#allocation10 + $0x28] sm:$0xff]  }
 0x25f   :  { %v1993_v38 = vpop.f32.mrf.mxu1 }
 0x260   :  { %v832_v41 = vmax.f32 %v1992_v35, 0.0 }
 0x261   :  { %v1994_v45 = vpop.f32.mrf.mxu1 }
 0x262   :  { %v2909_v50 = vmul.f32 %v1865_v37, %v832_v41  ;;  %v1995_v51 = vadd.f32 %v1994_v45, %v1993_v38  ;;  %v1872_v41 = vunpack.c.l.bf16 %v1918_v27 }
 0x263   :  { %v1996_v53 = vpop.f32.mrf.mxu1 }
 0x264   :  { %v833_v11 = vmax.f32 %v1995_v51, 0.0  ;;  %v1873_v51 = vunpack.c.h.bf16 %v1918_v27 }
 0x265   :  { %v1997_v10 = vpop.f32.mrf.mxu1 }
 0x266   :  { %v1998_v13 = vadd.f32 %v1997_v10, %v1996_v53  ;;  %v2913_v20 = vmul.f32 %v1868_v12, %v833_v11 }
 0x267   :  { %v1999_v15 = vpop.f32.mrf.mxu1 }
 0x268   :  { %v834_v16 = vmax.f32 %v1998_v13, 0.0 }
 0x269   :  { %v2000_v19 = vpop.f32.mrf.mxu1 }
 0x26a   :  { %v2915_v21 = vmul.f32 %v1869_v14, %v834_v16  ;;  %v2001_v25 = vadd.f32 %v2000_v19, %v1999_v15  ;;  %v1919_v14 = vld [vmem:[#allocation10 + $0x30] sm:$0xff]  }
 0x26b   :  { %v2002_v31 = vpop.f32.mrf.mxu1  ;;  %v1876_v58 = vunpack.c.l.bf16 %v1919_v14  ;;  %v1877_v24 = vunpack.c.h.bf16 %v1919_v14 }
 0x26c   :  { %v835_v38 = vmax.f32 %v2001_v25, 0.0 }
 0x26d   :  { %v2003_v37 = vpop.f32.mrf.mxu1 }
 0x26e   :  { %v2004_v45 = vadd.f32 %v2003_v37, %v2002_v31  ;;  %v2919_v13 = vmul.f32 %v1872_v41, %v835_v38 }
 0x26f   :  { %v2005_v53 = vpop.f32.mrf.mxu1 }
 0x270   :  { %v836_v52 = vmax.f32 %v2004_v45, 0.0 }
 0x271   :  { %v2006_v10 = vpop.f32.mrf.mxu1 }
 0x272   :  { %v2921_v11 = vmul.f32 %v1873_v51, %v836_v52  ;;  %v2007_v12 = vadd.f32 %v2006_v10, %v2005_v53  ;;  %v1920_v51 = vld [vmem:[#allocation10 + $0x38] sm:$0xff]  }
 0x273   :  { %v2008_v15 = vpop.f32.mrf.mxu1  ;;  %v1880_v35 = vunpack.c.l.bf16 %v1920_v51  ;;  %v1881_v16 = vunpack.c.h.bf16 %v1920_v51 }
 0x274   :  { %v837_v28 = vmax.f32 %v2007_v12, 0.0 }
 0x275   :  { %v2009_v19 = vpop.f32.mrf.mxu1 }
 0x276   :  { %v2010_v25 = vadd.f32 %v2009_v19, %v2008_v15  ;;  %v2925_v45 = vmul.f32 %v1876_v58, %v837_v28 }
 0x277   :  { %v2011_v31 = vpop.f32.mrf.mxu1 }
 0x278   :  { %v838_v27 = vmax.f32 %v2010_v25, 0.0 }
 0x279   :  { %v2012_v37 = vpop.f32.mrf.mxu1 }
 0x27a   :  { %v2927_v38 = vmul.f32 %v1877_v24, %v838_v27  ;;  %v2013_v41 = vadd.f32 %v2012_v37, %v2011_v31  ;;  %v1921_v24 = vld [vmem:[#allocation10 + $0x40] sm:$0xff]  }
 0x27b   :  { %v2014_v53 = vpop.f32.mrf.mxu1  ;;  %v1884_v8 = vunpack.c.l.bf16 %v1921_v24  ;;  %v1885_v7 = vunpack.c.h.bf16 %v1921_v24 }
 0x27c   :  { %v839_v9 = vmax.f32 %v2013_v41, 0.0 }
 0x27d   :  { %v2015_v10 = vpop.f32.mrf.mxu1 }
 0x27e   :  { %v2016_v12 = vadd.f32 %v2015_v10, %v2014_v53  ;;  %v2931_v25 = vmul.f32 %v1880_v35, %v839_v9 }
 0x27f   :  { %v2017_v15 = vpop.f32.mrf.mxu1 }
 0x280   :  { %v840_v14 = vmax.f32 %v2016_v12, 0.0 }
 0x281   :  { %v2018_v19 = vpop.f32.mrf.mxu1 }
 0x282   :  { %v2933_v28 = vmul.f32 %v1881_v16, %v840_v14  ;;  %v2019_v58 = vadd.f32 %v2018_v19, %v2017_v15  ;;  %v1922_v16 = vld [vmem:[#allocation10 + $0x48] sm:$0xff]  }
 0x283   :  { %v2020_v31 = vpop.f32.mrf.mxu1  ;;  %v1888_v6 = vunpack.c.l.bf16 %v1922_v16  ;;  %v1889_v5 = vunpack.c.h.bf16 %v1922_v16 }
 0x284   :  { %v841_v52 = vmax.f32 %v2019_v58, 0.0 }
 0x285   :  { %v2021_v37 = vpop.f32.mrf.mxu1 }
 0x286   :  { %v2022_v41 = vadd.f32 %v2021_v37, %v2020_v31  ;;  %v2937_v12 = vmul.f32 %v1884_v8, %v841_v52 }
 0x287   :  { %v2023_v53 = vpop.f32.mrf.mxu1 }
 0x288   :  { %v842_v51 = vmax.f32 %v2022_v41, 0.0 }
 0x289   :  { %v2024_v10 = vpop.f32.mrf.mxu1 }
 0x28a   :  { %v2939_v9 = vmul.f32 %v1885_v7, %v842_v51  ;;  %v2025_v35 = vadd.f32 %v2024_v10, %v2023_v53 }
 0x28b   :  { %v2026_v15 = vpop.f32.mrf.mxu1 }
 0x28c   :  { %v843_v27 = vmax.f32 %v2025_v35, 0.0 }
 0x28d   :  { %v2027_v19 = vpop.f32.mrf.mxu1 }
 0x28e   :  { %v2028_v58 = vadd.f32 %v2027_v19, %v2026_v15  ;;  %v2947_v8 = vmul.f32 %v1888_v6, %v843_v27 }
 0x28f   :  { %v2943_v31 = vpop.f32.mrf.mxu1 }
 0x290   :  { %v844_v24 = vmax.f32 %v2028_v58, 0.0 }
 0x291   :  { %v2945_v37 = vpop.f32.mrf.mxu1 }
 0x292   :  { %v2949_v7 = vmul.f32 %v1889_v5, %v844_v24 }
 0x293   :  { %v2951_v52 = vpop.f32.mrf.mxu1 }
 0x295   :  { %v2955_v53 = vpop.f32.mrf.mxu1 }
 0x297   :  { %v2035_v51 = vpop.f32.mrf.mxu1 }
 0x299   :  { %v2036_v10 = vpop.f32.mrf.mxu1 }
 0x29b   :  { %v2038_v35 = vpop.f32.mrf.mxu1 }
 0x29d   :  { %v2039_v16 = vpop.f32.mrf.mxu1 }
 0x29f   :  { %v2041_v15 = vpop.f32.mrf.mxu1 }
 0x2a1   :  { %v2042_v19 = vpop.f32.mrf.mxu1 }
 0x2a2   :  { %v2043_v40 = vadd.f32 %v2042_v19, %v2041_v15  ;;  %v2379_v15 = vld [vmem:[#allocation8 + $0x38] sm:$0xff]   ;;  %v2380_v19 = vld [vmem:[#allocation8 + $0x30] sm:$0xff]  }
 0x2a3   :  { %v2044_v58 = vpop.f32.mrf.mxu1  ;;  %2249 = vmatprep.subr.bf16.mxu1 %v2379_v15 }
 0x2a4   :  { %2250 = vmatpush3.bf16.msra.mxu1 %v2379_v15 }
 0x2a5   :  { %v2045_v14 = vpop.f32.mrf.mxu1  ;;  %2251 = vmatprep.subr.bf16.mxu1 %v2380_v19 }
 0x2a6   :  { %v2046_v26 = vadd.f32 %v2045_v14, %v2044_v58  ;;  %v3478_v58 = vld [vmem:[#allocation23_spill] sm:$0xff] }
 0x2a7   :  { %v2047_v4 = vpop.f32.mrf.mxu1 }
 0x2a8   :  { %2252 = vmatpush3.bf16.msra.mxu1 %v2380_v19 }
 0x2a9   :  { %v2048_v6 = vpop.f32.mrf.mxu1 }
 0x2aa   :  { %v2049_v33 = vadd.f32 %v2048_v6, %v2047_v4  ;;  %v3479_v6 = vld [vmem:[#allocation24_spill] sm:$0xff] }
 0x2ab   :  { %v2050_v27 = vpop.f32.mrf.mxu1 }
 0x2ac   :  { %v851_v22 = vmax.f32 %v2049_v33, 0.0 }
 0x2ad   :  { %v2051_v5 = vpop.f32.mrf.mxu1 }
 0x2ae   :  { %v2052_v44 = vadd.f32 %v2051_v5, %v2050_v27  ;;  %v3480_v5 = vld [vmem:[#allocation25_spill] sm:$0xff] }
 0x2af   :  { %v2053_v24 = vpop.f32.mrf.mxu1 }
 0x2b1   :  { %v2054_v3 = vpop.f32.mrf.mxu1 }
 0x2b2   :  { %v2055_v59 = vadd.f32 %v2054_v3, %v2053_v24  ;;  %v1904_v24 = vunpack.c.l.bf16 %v1926_v32 }
 0x2b3   :  { %v2056_v2 = vpop.f32.mrf.mxu1 }
 0x2b4   :  { %v853_v30 = vmax.f32 %v2055_v59, 0.0 }
 0x2b5   :  { %v2057_v1 = vpop.f32.mrf.mxu1 }
 0x2b6   :  { %v2058_v63 = vadd.f32 %v2057_v1, %v2056_v2  ;;  %v1905_v1 = vunpack.c.h.bf16 %v1926_v32  ;;  %v949_v61 = vmul.f32 %v1908_v29, %v853_v30  ;;  %v947_v32 = vmul.f32 %v1904_v24, %v851_v22  ;;  %v3486_v24 = vld [vmem:[#allocation31_spill] sm:$0xff] }
 0x2b7   :  { %v2059_v0 = vpop.f32.mrf.mxu1  ;;  %v2034_v29 = vadd.f32 %v2955_v53, %v2951_v52  ;;  %v3462_v52 = vpack.c.bf16 %v2921_v11, %v2919_v13  ;;  %v3465_v13 = vpack.c.bf16 %v2903_v18, %v2901_v17  ;;  %v3466_v11 = vpack.c.bf16 %v2949_v7, %v2947_v8  ;;  %v3469_v17 = vld [vmem:[#allocation47_spill] sm:$0xff]  ;;  %v2382_v8 = vld [vmem:[#allocation8 + $0x20] sm:$0xff]   ;;  %v3472_v7 = vld [vmem:[#allocation17_spill] sm:$0xff] }
 0x2b8   :  { %v854_v43 = vmax.f32 %v2058_v63, 0.0  ;;  %v1901_v63 = vunpack.c.h.bf16 %v1925_v39  ;;  %v3470_v18 = vpack.c.bf16 %v2891_v23, %v3469_v17  ;;  %v3477_v23 = vld [vmem:[#allocation22_spill] sm:$0xff] }
 0x2b9   :  { %v2060_v41 = vpop.f32.mrf.mxu1  ;;  %v846_v22 = vmax.f32 %v2034_v29, 0.0  ;;  %v3497_v29 = vld [vmem:[#allocation42_spill] sm:$0xff] }
 0x2ba   :  { %v2061_v62 = vadd.f32 %v2060_v41, %v2059_v0  ;;  %v852_v0 = vmax.f32 %v2052_v44, 0.0  ;;  %v950_v2 = vmul.f32 %v1909_v56, %v854_v43  ;;  %v2037_v44 = vadd.f32 %v2036_v10, %v2035_v51  ;;  %v1924_v43 = vld [vmem:[#allocation10 + $0x58] sm:$0xff]  }
 0x2bb   :  { %v2062_v60 = vpop.f32.mrf.mxu1  ;;  %v2031_v56 = vadd.f32 %v2945_v37, %v2943_v31  ;;  %v1896_v4 = vunpack.c.l.bf16 %v1924_v43  ;;  %v3463_v31 = vpack.c.bf16 %v2915_v21, %v2913_v20  ;;  %v3467_v20 = vpack.c.bf16 %v2897_v47, %v2895_v49  ;;  %v3473_v49 = vld [vmem:[#allocation18_spill] sm:$0xff]  ;;  %v3474_v47 = vld [vmem:[#allocation19_spill] sm:$0xff] }
 0x2bc   :  { %v855_v36 = vmax.f32 %v2061_v62, 0.0  ;;  %v2040_v62 = vadd.f32 %v2039_v16, %v2038_v35  ;;  %v967_v59 = vpack.c.bf16 %v950_v2, %v949_v61  ;;  %v847_v57 = vmax.f32 %v2037_v44, 0.0  ;;  %v3483_v2 = vld [vmem:[#allocation28_spill] sm:$0xff] }
 0x2bd   :  { %v2063_v54 = vpop.f32.mrf.mxu1  ;;  %v845_v53 = vmax.f32 %v2031_v56, 0.0  ;;  %v3464_v16 = vpack.c.bf16 %v2909_v50, %v2907_v48  ;;  %v3468_v21 = vpack.c.bf16 %v2939_v9, %v2937_v12  ;;  %v2381_v48 = vld [vmem:[#allocation8 + $0x28] sm:$0xff]   ;;  %v3471_v50 = vld [vmem:[#allocation16_spill] sm:$0xff] }
 0x2be   :  { %v2064_v34 = vadd.f32 %v2063_v54, %v2062_v60  ;;  %v951_v41 = vmul.f32 %v1912_v55, %v855_v36  ;;  %v850_v54 = vmax.f32 %v2046_v26, 0.0  ;;  %v948_v60 = vmul.f32 %v1905_v1, %v852_v0  ;;  %2253 = vmatprep.subr.bf16.mxu1 %v2381_v48  ;;  %v3475_v12 = vld [vmem:[#allocation20_spill] sm:$0xff]  ;;  %v3476_v9 = vld [vmem:[#allocation21_spill] sm:$0xff]  ;;  %v3481_v1 = vld [vmem:[#allocation26_spill] sm:$0xff] }
 0x2bf   :  { %v849_v36 = vmax.f32 %v2043_v40, 0.0  ;;  %v848_v30 = vmax.f32 %v2040_v62, 0.0  ;;  %v3461_v55 = vpack.c.bf16 %v2927_v38, %v2925_v45  ;;  %v943_v45 = vmul.f32 %v1896_v4, %v847_v57  ;;  %2254 = vmatpush3.bf16.msra.mxu1 %v2381_v48  ;;  %v3482_v0 = vld [vmem:[#allocation27_spill] sm:$0xff]  ;;  %v3487_v61 = vld [vmem:[#allocation32_spill] sm:$0xff]  ;;  %v2384_v62 = vld [vmem:[#allocation8 + $0x10] sm:$0xff]  }
 0x2c0   :  { %v856_v42 = vmax.f32 %v2064_v34, 0.0  ;;  %v3460_v34 = vpack.c.bf16 %v2933_v28, %v2931_v25  ;;  %v946_v33 = vmul.f32 %v1901_v63, %v850_v54  ;;  %v966_v26 = vpack.c.bf16 %v948_v60, %v947_v32  ;;  %2255 = vmatprep.subr.bf16.mxu1 %v2382_v8  ;;  %v2383_v63 = vld [vmem:[#allocation8 + $0x18] sm:$0xff]   ;;  %v3489_v54 = vld [vmem:[#allocation34_spill] sm:$0xff]  ;;  %v3491_v44 = vld [vmem:[#allocation36_spill] sm:$0xff] }
 0x2c1   :  { %v3490_v60 = vld [vmem:[#allocation35_spill] sm:$0xff]  ;;  %v3495_v32 = vld [vmem:[#allocation40_spill] sm:$0xff] }
 0x2c2   :  { %v952_v3 = vmul.f32 %v1913_v46, %v856_v42  ;;  %v1900_v42 = vunpack.c.l.bf16 %v1925_v39  ;;  %v1897_v46 = vunpack.c.h.bf16 %v1924_v43  ;;  %v1923_v39 = vld [vmem:[#allocation10 + $0x50] sm:$0xff]   ;;  %v3492_v43 = vld [vmem:[#allocation37_spill] sm:$0xff] }
 0x2c3   :  { %v1893_v25 = vunpack.c.h.bf16 %v1923_v39  ;;  %v1892_v51 = vunpack.c.l.bf16 %v1923_v39  ;;  %2256 = vmatpush3.bf16.msra.mxu1 %v2382_v8 }
 0x2c4   :  { %v968_v27 = vpack.c.bf16 %v952_v3, %v951_v41  ;;  %v945_v40 = vmul.f32 %v1900_v42, %v849_v36  ;;  %v944_v28 = vmul.f32 %v1897_v46, %v848_v30  ;;  %v3484_v41 = vld [vmem:[#allocation29_spill] sm:$0xff]  ;;  %v3485_v3 = vld [vmem:[#allocation30_spill] sm:$0xff]  ;;  %2257 = vmatprep.subr.bf16.mxu1 %v2383_v63  ;;  %v3494_v42 = vld [vmem:[#allocation39_spill] sm:$0xff] }
 0x2c5   :  { %v942_v38 = vmul.f32 %v1893_v25, %v846_v22  ;;  %v941_v37 = vmul.f32 %v1892_v51, %v845_v53  ;;  %v3493_v36 = vld [vmem:[#allocation38_spill] sm:$0xff]  ;;  %v3496_v46 = vld [vmem:[#allocation41_spill] sm:$0xff]  ;;  %v3498_v30 = vld [vmem:[#allocation43_spill] sm:$0xff] }
 0x2c6   :  { %2065 = vmatprep.subr.bf16.mxu0 %v968_v27  ;;  %v965_v14 = vpack.c.bf16 %v946_v33, %v945_v40  ;;  %v964_v10 = vpack.c.bf16 %v944_v28, %v943_v45  ;;  %v3488_v27 = vld [vmem:[#allocation33_spill] sm:$0xff]  ;;  %v3499_v33 = vld [vmem:[#allocation44_spill] sm:$0xff] }
 0x2c7   :  { %2066 = vmatpush3.bf16.msra.mxu0 %v3460_v34  ;;  %v963_v35 = vpack.c.bf16 %v942_v38, %v941_v37  ;;  %2258 = vmatpush3.bf16.msra.mxu1 %v2383_v63  ;;  %v2386_v34 = vld [vmem:[#allocation8] sm:$0xff]  }
 0x2c8   :  { %2067 = vmatprep.subr.bf16.mxu0 %v967_v59  ;;  %2259 = vmatprep.subr.bf16.mxu1 %v2384_v62  ;;  %v2385_v59 = vld [vmem:[#allocation8 + $0x8] sm:$0xff]  }
 0x2cb   :  { %2068 = vmatpush3.bf16.msra.mxu0 %v3461_v55  ;;  %2260 = vmatpush3.bf16.msra.mxu1 %v2384_v62  ;;  %v3501_v55 = vld [vmem:[#allocation46_spill] sm:$0xff] }
 0x2cc   :  { %2069 = vmatprep.subr.bf16.mxu0 %v966_v26  ;;  %2261 = vmatprep.subr.bf16.mxu1 %v2385_v59  ;;  %v3500_v26 = vld [vmem:[#allocation45_spill] sm:$0xff] }
 0x2cf   :  { %2070 = vmatpush3.bf16.msra.mxu0 %v3462_v52  ;;  %2262 = vmatpush3.bf16.msra.mxu1 %v2385_v59 }
 0x2d0   :  { %2071 = vmatprep.subr.bf16.mxu0 %v965_v14  ;;  %2263 = vmatprep.subr.bf16.mxu1 %v2386_v34 }
 0x2d3   :  { %2072 = vmatpush3.bf16.msra.mxu0 %v3463_v31  ;;  %2264 = vmatpush3.bf16.msra.mxu1 %v2386_v34 }
 0x2d4   :  { %2073 = vmatprep.subr.bf16.mxu0 %v964_v10 }
 0x2d7   :  { %2074 = vmatpush3.bf16.msra.mxu0 %v3464_v16 }
 0x2d8   :  { %2075 = vmatprep.subr.bf16.mxu0 %v963_v35 }
 0x2db   :  { %2076 = vmatpush3.bf16.msra.mxu0 %v3465_v13 }
 0x2dc   :  { %2077 = vmatprep.subr.bf16.mxu0 %v3466_v11 }
 0x2df   :  { %2078 = vmatpush3.bf16.msra.mxu0 %v3467_v20 }
 0x2e0   :  { %2079 = vmatprep.subr.bf16.mxu0 %v3468_v21 }
 0x2e3   :  { %2080 = vmatpush3.bf16.msra.mxu0 %v3470_v18 }
 0x2e6   :  { %1002 = vmatmul.mubr.bf16.vlgmr.msra.gmra.mxu0 %v3471_v50 }
 0x2e7   :  { %1009 = vmatprep.mubr.bf16.mxu0 %v3472_v7 }
 0x2ee   :  { %1010 = vmatmul.mubr.bf16.gmra.mxu0 %v3473_v49 }
 0x2ef   :  { %1017 = vmatprep.mubr.bf16.mxu0 %v3474_v47 }
 0x2f6   :  { %1018 = vmatmul.mubr.bf16.gmra.mxu0 %v3475_v12 }
 0x2f7   :  { %1025 = vmatprep.mubr.bf16.mxu0 %v3476_v9 }
 0x2fe   :  { %1026 = vmatmul.mubr.bf16.gmra.mxu0 %v3477_v23 }
 0x2ff   :  { %1033 = vmatprep.mubr.bf16.mxu0 %v3478_v58 }
 0x306   :  { %1034 = vmatmul.mubr.bf16.gmra.mxu0 %v3479_v6 }
 0x307   :  { %1041 = vmatprep.mubr.bf16.mxu0 %v3480_v5 }
 0x30e   :  { %1042 = vmatmul.mubr.bf16.gmra.mxu0 %v3481_v1 }
 0x30f   :  { %1049 = vmatprep.mubr.bf16.mxu0 %v3482_v0 }
 0x316   :  { %1050 = vmatmul.mubr.bf16.gmra.mxu0 %v3483_v2 }
 0x317   :  { %1057 = vmatprep.mubr.bf16.mxu0 %v3484_v41 }
 0x31e   :  { %1058 = vmatmul.mubr.bf16.gmra.mxu0 %v3485_v3 }
 0x31f   :  { %1065 = vmatprep.mubr.bf16.mxu0 %v3486_v24 }
 0x326   :  { %1066 = vmatmul.mubr.bf16.gmra.mxu0 %v3487_v61 }
 0x327   :  { %1073 = vmatprep.mubr.bf16.mxu0 %v3488_v27 }
 0x32e   :  { %1074 = vmatmul.mubr.bf16.gmra.mxu0 %v3489_v54 }
 0x32f   :  { %1081 = vmatprep.mubr.bf16.mxu0 %v3490_v60 }
 0x336   :  { %1082 = vmatmul.mubr.bf16.gmra.mxu0 %v3491_v44 }
 0x337   :  { %1089 = vmatprep.mubr.bf16.mxu0 %v3492_v43 }
 0x33e   :  { %1090 = vmatmul.mubr.bf16.gmra.mxu0 %v3493_v36 }
 0x33f   :  { %1097 = vmatprep.mubr.bf16.mxu0 %v3494_v42 }
 0x346   :  { %1098 = vmatmul.mubr.bf16.gmra.mxu0 %v3495_v32 }
 0x347   :  { %1105 = vmatprep.mubr.bf16.mxu0 %v3496_v46 }
 0x34e   :  { %1106 = vmatmul.mubr.bf16.gmra.mxu0 %v3497_v29 }
 0x34f   :  { %1113 = vmatprep.mubr.bf16.mxu0 %v3498_v30 }
 0x356   :  { %1114 = vmatmul.mubr.bf16.gmra.mxu0 %v3499_v33 }
 0x357   :  { %1121 = vmatprep.mubr.bf16.mxu0 %v3500_v26 }
 0x35e   :  { %1122 = vmatmul.mubr.bf16.gmra.mxu0 %v3501_v55 }
 0x3a6   :  { %v2081_v56 = vpop.f32.mrf.mxu0 }
 0x3a8   :  { %v2082_v57 = vpop.f32.mrf.mxu0 }
 0x3a9   :  { %v2083_v39 = vadd.f32 %v2082_v57, %v2081_v56 }
 0x3aa   :  { %v2084_v4 = vpop.f32.mrf.mxu0 }
 0x3ac   :  { %v2085_v40 = vpop.f32.mrf.mxu0 }
 0x3ad   :  { %v2086_v22 = vadd.f32 %v2085_v40, %v2084_v4 }
 0x3ae   :  { %v2087_v25 = vpop.f32.mrf.mxu0 }
 0x3af   :  { %v1130_v28 = vpack.c.bf16 %v2086_v22, %v2083_v39 }
 0x3b0   :  { %v2088_v14 = vpop.f32.mrf.mxu0 }
 0x3b1   :  { %2265 = vmatprep.mubr.bf16.mxu1 %v1130_v28  ;;  %v2089_v51 = vadd.f32 %v2088_v14, %v2087_v25 }
 0x3b2   :  { %v2090_v52 = vpop.f32.mrf.mxu0 }
 0x3b4   :  { %v2091_v53 = vpop.f32.mrf.mxu0 }
 0x3b5   :  { %v2092_v45 = vadd.f32 %v2091_v53, %v2090_v52 }
 0x3b6   :  { %v2093_v38 = vpop.f32.mrf.mxu0 }
 0x3b7   :  { %v1131_v10 = vpack.c.bf16 %v2092_v45, %v2089_v51 }
 0x3b8   :  { %v2094_v31 = vpop.f32.mrf.mxu0 }
 0x3b9   :  { %2266 = vmatmul.mubr.bf16.vlgmr.msra.gmra.mxu1 %v1131_v10  ;;  %v2095_v16 = vadd.f32 %v2094_v31, %v2093_v38 }
 0x3ba   :  { %v2096_v37 = vpop.f32.mrf.mxu0 }
 0x3bc   :  { %v2097_v35 = vpop.f32.mrf.mxu0 }
 0x3bd   :  { %v2098_v13 = vadd.f32 %v2097_v35, %v2096_v37 }
 0x3be   :  { %v2099_v11 = vpop.f32.mrf.mxu0 }
 0x3bf   :  { %v1132_v15 = vpack.c.bf16 %v2098_v13, %v2095_v16 }
 0x3c0   :  { %v2100_v19 = vpop.f32.mrf.mxu0 }
 0x3c1   :  { %2269 = vmatprep.mubr.bf16.mxu1 %v1132_v15  ;;  %v2101_v48 = vadd.f32 %v2100_v19, %v2099_v11 }
 0x3c2   :  { %v2102_v20 = vpop.f32.mrf.mxu0 }
 0x3c4   :  { %v2103_v21 = vpop.f32.mrf.mxu0 }
 0x3c5   :  { %v2104_v17 = vadd.f32 %v2103_v21, %v2102_v20 }
 0x3c6   :  { %v2105_v18 = vpop.f32.mrf.mxu0 }
 0x3c7   :  { %v1133_v50 = vpack.c.bf16 %v2104_v17, %v2101_v48 }
 0x3c8   :  { %v2106_v8 = vpop.f32.mrf.mxu0 }
 0x3c9   :  { %2270 = vmatmul.mubr.bf16.gmra.mxu1 %v1133_v50  ;;  %v2107_v47 = vadd.f32 %v2106_v8, %v2105_v18 }
 0x3ca   :  { %v2108_v7 = vpop.f32.mrf.mxu0 }
 0x3cc   :  { %v2109_v49 = vpop.f32.mrf.mxu0 }
 0x3cd   :  { %v2110_v12 = vadd.f32 %v2109_v49, %v2108_v7 }
 0x3ce   :  { %v2111_v9 = vpop.f32.mrf.mxu0 }
 0x3cf   :  { %v1134_v23 = vpack.c.bf16 %v2110_v12, %v2107_v47 }
 0x3d0   :  { %v2112_v58 = vpop.f32.mrf.mxu0 }
 0x3d1   :  { %2273 = vmatprep.mubr.bf16.mxu1 %v1134_v23  ;;  %v2113_v1 = vadd.f32 %v2112_v58, %v2111_v9 }
 0x3d2   :  { %v2114_v6 = vpop.f32.mrf.mxu0 }
 0x3d4   :  { %v2115_v5 = vpop.f32.mrf.mxu0 }
 0x3d5   :  { %v2116_v0 = vadd.f32 %v2115_v5, %v2114_v6 }
 0x3d6   :  { %v2117_v2 = vpop.f32.mrf.mxu0 }
 0x3d7   :  { %v1135_v41 = vpack.c.bf16 %v2116_v0, %v2113_v1 }
 0x3d8   :  { %v2118_v3 = vpop.f32.mrf.mxu0 }
 0x3d9   :  { %2274 = vmatmul.mubr.bf16.gmra.mxu1 %v1135_v41  ;;  %v2119_v27 = vadd.f32 %v2118_v3, %v2117_v2 }
 0x3da   :  { %v2120_v24 = vpop.f32.mrf.mxu0 }
 0x3dc   :  { %v2121_v61 = vpop.f32.mrf.mxu0 }
 0x3dd   :  { %v2122_v63 = vadd.f32 %v2121_v61, %v2120_v24 }
 0x3de   :  { %v2123_v62 = vpop.f32.mrf.mxu0 }
 0x3df   :  { %v1136_v54 = vpack.c.bf16 %v2122_v63, %v2119_v27 }
 0x3e0   :  { %v2124_v60 = vpop.f32.mrf.mxu0 }
 0x3e1   :  { %2277 = vmatprep.mubr.bf16.mxu1 %v1136_v54  ;;  %v2125_v44 = vadd.f32 %v2124_v60, %v2123_v62  ;;  %v1410_v62 = vlaneseq  ;;  %v3025_v54 = vld [vmem:[%s3393_s5] ss:$0 sm:$0xff]  ;;  %s2652_s5 = smov [#allocation11]  }
 0x3e2   :  { %v2126_v59 = vpop.f32.mrf.mxu0  ;;  %s1770_s30 = sshll.u32 %s2652_s5, 4  ;;  %s1771_s30 = int_to_ptr.vmem [resolvable:$true] %s1770_s30 }
 0x3e3   :  { %v3027_v60 = vand.u32 127, %v1410_v62  ;;  %s2615_s8 = scalar_lea.vmem %s1771_s30, 4096  ;;  %p2620_p12 = scmp.lt.s32.totalorder %s1771_s30, %s1771_s30 }
 0x3e4   :  { %v2127_v34 = vpop.f32.mrf.mxu0  ;;  %p2616_p11 = scmp.ne.s32.totalorder %s1771_s30, %s2615_s8  ;;  %p2621_p13 = scmp.lt.s32.totalorder %s2615_s8, %s2615_s8 }
 0x3e5   :  { %v2128_v43 = vadd.f32 %v2127_v34, %v2126_v59  ;;  %vm1412_vm0 = vcmp.lt.s32.totalorder %v3027_v60, 16 }
 0x3e6   :  { %v2129_v36 = vpop.f32.mrf.mxu0  ;;  %p2622_p0 = por %p2621_p13, %p2620_p12 }
 0x3e7   :  { %v1137_v42 = vpack.c.bf16 %v2128_v43, %v2125_v44 }
 0x3e8   :  { %v2130_v32 = vpop.f32.mrf.mxu0  ;;  %p2623_p1 = pnand %p2622_p0, %p2616_p11 }
 0x3e9   :  { %2278 = vmatmul.mubr.bf16.gmra.mxu1 %v1137_v42  ;;  %v2131_v30 = vadd.f32 %v2130_v32, %v2129_v36 }
 0x3ea   :  { %v2132_v46 = vpop.f32.mrf.mxu0 }
 0x3ec   :  { %v2133_v29 = vpop.f32.mrf.mxu0 }
 0x3ed   :  { %v2134_v33 = vadd.f32 %v2133_v29, %v2132_v46 }
 0x3ee   :  { %v2135_v26 = vpop.f32.mrf.mxu0 }
 0x3ef   :  { %v1138_v55 = vpack.c.bf16 %v2134_v33, %v2131_v30 }
 0x3f0   :  { %v2136_v56 = vpop.f32.mrf.mxu0 }
 0x3f1   :  { %2281 = vmatprep.mubr.bf16.mxu1 %v1138_v55  ;;  %v2137_v40 = vadd.f32 %v2136_v56, %v2135_v26 }
 0x3f2   :  { %v2138_v57 = vpop.f32.mrf.mxu0 }
 0x3f4   :  { %v2139_v4 = vpop.f32.mrf.mxu0 }
 0x3f5   :  { %v2140_v39 = vadd.f32 %v2139_v4, %v2138_v57 }
 0x3f6   :  { %v2141_v22 = vpop.f32.mrf.mxu0 }
 0x3f7   :  { %v1139_v25 = vpack.c.bf16 %v2140_v39, %v2137_v40 }
 0x3f8   :  { %v2142_v28 = vpop.f32.mrf.mxu0 }
 0x3f9   :  { %2282 = vmatmul.mubr.bf16.gmra.mxu1 %v1139_v25  ;;  %v2143_v53 = vadd.f32 %v2142_v28, %v2141_v22 }
 0x3fa   :  { %v2144_v14 = vpop.f32.mrf.mxu0 }
 0x3fc   :  { %v2145_v52 = vpop.f32.mrf.mxu0 }
 0x3fd   :  { %v2146_v51 = vadd.f32 %v2145_v52, %v2144_v14 }
 0x3fe   :  { %v2147_v45 = vpop.f32.mrf.mxu0 }
 0x3ff   :  { %v1140_v38 = vpack.c.bf16 %v2146_v51, %v2143_v53 }
 0x400   :  { %v2148_v10 = vpop.f32.mrf.mxu0 }
 0x401   :  { %2285 = vmatprep.mubr.bf16.mxu1 %v1140_v38  ;;  %v2149_v35 = vadd.f32 %v2148_v10, %v2147_v45 }
 0x402   :  { %v2150_v31 = vpop.f32.mrf.mxu0 }
 0x404   :  { %v2151_v37 = vpop.f32.mrf.mxu0 }
 0x405   :  { %v2152_v16 = vadd.f32 %v2151_v37, %v2150_v31 }
 0x406   :  { %v2153_v13 = vpop.f32.mrf.mxu0 }
 0x407   :  { %v1141_v11 = vpack.c.bf16 %v2152_v16, %v2149_v35 }
 0x408   :  { %v2154_v15 = vpop.f32.mrf.mxu0 }
 0x409   :  { %2286 = vmatmul.mubr.bf16.gmra.mxu1 %v1141_v11  ;;  %v2155_v21 = vadd.f32 %v2154_v15, %v2153_v13 }
 0x40a   :  { %v2156_v19 = vpop.f32.mrf.mxu0 }
 0x40c   :  { %v2157_v20 = vpop.f32.mrf.mxu0 }
 0x40d   :  { %v2158_v48 = vadd.f32 %v2157_v20, %v2156_v19 }
 0x40e   :  { %v2159_v17 = vpop.f32.mrf.mxu0 }
 0x40f   :  { %v1142_v18 = vpack.c.bf16 %v2158_v48, %v2155_v21 }
 0x410   :  { %v2160_v50 = vpop.f32.mrf.mxu0 }
 0x411   :  { %2289 = vmatprep.mubr.bf16.mxu1 %v1142_v18  ;;  %v2161_v49 = vadd.f32 %v2160_v50, %v2159_v17 }
 0x412   :  { %v2162_v8 = vpop.f32.mrf.mxu0 }
 0x414   :  { %v2163_v7 = vpop.f32.mrf.mxu0 }
 0x415   :  { %v2164_v47 = vadd.f32 %v2163_v7, %v2162_v8 }
 0x416   :  { %v2165_v12 = vpop.f32.mrf.mxu0 }
 0x417   :  { %v1143_v9 = vpack.c.bf16 %v2164_v47, %v2161_v49 }
 0x418   :  { %v2166_v23 = vpop.f32.mrf.mxu0 }
 0x419   :  { %2290 = vmatmul.mubr.bf16.gmra.mxu1 %v1143_v9  ;;  %v2167_v5 = vadd.f32 %v2166_v23, %v2165_v12 }
 0x41a   :  { %v2168_v58 = vpop.f32.mrf.mxu0 }
 0x41c   :  { %v2169_v6 = vpop.f32.mrf.mxu0 }
 0x41d   :  { %v2170_v1 = vadd.f32 %v2169_v6, %v2168_v58 }
 0x41e   :  { %v2171_v0 = vpop.f32.mrf.mxu0 }
 0x41f   :  { %v1144_v2 = vpack.c.bf16 %v2170_v1, %v2167_v5 }
 0x420   :  { %v2172_v41 = vpop.f32.mrf.mxu0 }
 0x421   :  { %2293 = vmatprep.mubr.bf16.mxu1 %v1144_v2  ;;  %v2173_v61 = vadd.f32 %v2172_v41, %v2171_v0 }
 0x422   :  { %v2174_v3 = vpop.f32.mrf.mxu0 }
 0x424   :  { %v2175_v24 = vpop.f32.mrf.mxu0 }
 0x425   :  { %v2176_v27 = vadd.f32 %v2175_v24, %v2174_v3 }
 0x427   :  { %v1145_v63 = vpack.c.bf16 %v2176_v27, %v2173_v61 }
 0x429   :  { %2294 = vmatmul.mubr.bf16.gmra.mxu1 %v1145_v63 }
 0x479   :  { %v2267_v59 = vpop.f32.mrf.mxu1 }
 0x47a   :  { %v1260_v34 = vadd.f32 %v2267_v59, %v3025_v54 }
 0x47b   :  { %v1251_v44 = vpop.f32.mrf.mxu1 }
 0x47c   :  { %v1380_v43 = vmax.f32 %v1260_v34, 0.0  ;;  %v1252_v36 = vadd.f32 %v3025_v54, %v1251_v44 }
 0x47d   :  { %v2268_v42 = vpop.f32.mrf.mxu1 }
 0x47e   :  { %v1378_v32 = vmax.f32 %v1252_v36, 0.0  ;;  %v1263_v46 = vadd.f32 %v2268_v42, %v3025_v54  ;;  %v3035_v29 = vsel %vm1412_vm0, %v1380_v43, -1e+30 }
 0x47f   :  { %1449 = vmax.xlane.f32.xlu1 %v3035_v29  ;;  %v1254_v30 = vpop.f32.mrf.mxu1 }
 0x480   :  { %v1381_v33 = vmax.f32 %v1263_v46, 0.0  ;;  %v1255_v26 = vadd.f32 %v3025_v54, %v1254_v30  ;;  %v3041_v55 = vsel %vm1412_vm0, %v1378_v32, -1e+30 }
 0x481   :  { %1445 = vmax.xlane.f32.xlu0 %v3041_v55 }
 0x482   :  { %v1379_v56 = vmax.f32 %v1255_v26, 0.0  ;;  %v3046_v57 = vsel %vm1412_vm0, %v1381_v33, -1e+30 }
 0x483   :  { %1451 = vmax.xlane.f32.xlu1 %v3046_v57 }
 0x484   :  { %v3051_v4 = vsel %vm1412_vm0, %v1379_v56, -1e+30 }
 0x485   :  { %1447 = vmax.xlane.f32.xlu0 %v3051_v4 }
 0x489   :  { %v2271_v40 = vpop.f32.mrf.mxu1 }
 0x48a   :  { %v1276_v39 = vadd.f32 %v2271_v40, %v3025_v54 }
 0x48b   :  { %v1267_v22 = vpop.f32.mrf.mxu1 }
 0x48c   :  { %v1384_v25 = vmax.f32 %v1276_v39, 0.0  ;;  %v1268_v28 = vadd.f32 %v3025_v54, %v1267_v22 }
 0x48d   :  { %v2272_v14 = vpop.f32.mrf.mxu1 }
 0x48e   :  { %v1382_v52 = vmax.f32 %v1268_v28, 0.0  ;;  %v1279_v53 = vadd.f32 %v2272_v14, %v3025_v54  ;;  %v3059_v51 = vsel %vm1412_vm0, %v1384_v25, -1e+30 }
 0x48f   :  { %1457 = vmax.xlane.f32.xlu0 %v3059_v51  ;;  %v1270_v45 = vpop.f32.mrf.mxu1 }
 0x490   :  { %v1385_v38 = vmax.f32 %v1279_v53, 0.0  ;;  %v1271_v10 = vadd.f32 %v3025_v54, %v1270_v45  ;;  %v3069_v35 = vsel %vm1412_vm0, %v1382_v52, -1e+30 }
 0x492   :  { %v1383_v31 = vmax.f32 %v1271_v10, 0.0  ;;  %v3065_v37 = vsel %vm1412_vm0, %v1385_v38, -1e+30 }
 0x493   :  { %1459 = vmax.xlane.f32.xlu1 %v3065_v37  ;;  %1453 = vmax.xlane.f32.xlu0 %v3069_v35 }
 0x494   :  { %v3075_v16 = vsel %vm1412_vm0, %v1383_v31, -1e+30 }
 0x497   :  { %1455 = vmax.xlane.f32.xlu1 %v3075_v16 }
 0x499   :  { %v2275_v13 = vpop.f32.mrf.mxu1 }
 0x49a   :  { %v1292_v11 = vadd.f32 %v2275_v13, %v3025_v54 }
 0x49b   :  { %v1283_v15 = vpop.f32.mrf.mxu1 }
 0x49c   :  { %v1388_v19 = vmax.f32 %v1292_v11, 0.0  ;;  %v1284_v20 = vadd.f32 %v3025_v54, %v1283_v15 }
 0x49d   :  { %v2276_v21 = vpop.f32.mrf.mxu1 }
 0x49e   :  { %v1386_v48 = vmax.f32 %v1284_v20, 0.0  ;;  %v1295_v17 = vadd.f32 %v2276_v21, %v3025_v54  ;;  %v3083_v18 = vsel %vm1412_vm0, %v1388_v19, -1e+30 }
 0x49f   :  { %1465 = vmax.xlane.f32.xlu0 %v3083_v18  ;;  %v1286_v50 = vpop.f32.mrf.mxu1 }
 0x4a0   :  { %v1389_v8 = vmax.f32 %v1295_v17, 0.0  ;;  %v1287_v7 = vadd.f32 %v3025_v54, %v1286_v50  ;;  %v3093_v12 = vsel %vm1412_vm0, %v1386_v48, -1e+30 }
 0x4a2   :  { %v1387_v49 = vmax.f32 %v1287_v7, 0.0  ;;  %v3089_v47 = vsel %vm1412_vm0, %v1389_v8, -1e+30 }
 0x4a3   :  { %1467 = vmax.xlane.f32.xlu1 %v3089_v47  ;;  %1461 = vmax.xlane.f32.xlu0 %v3093_v12 }
 0x4a4   :  { %v3099_v9 = vsel %vm1412_vm0, %v1387_v49, -1e+30 }
 0x4a7   :  { %1463 = vmax.xlane.f32.xlu1 %v3099_v9 }
 0x4a9   :  { %v2279_v23 = vpop.f32.mrf.mxu1 }
 0x4aa   :  { %v1308_v58 = vadd.f32 %v2279_v23, %v3025_v54 }
 0x4ab   :  { %v1299_v6 = vpop.f32.mrf.mxu1 }
 0x4ac   :  { %v1392_v5 = vmax.f32 %v1308_v58, 0.0  ;;  %v1300_v1 = vadd.f32 %v3025_v54, %v1299_v6 }
 0x4ad   :  { %v2280_v0 = vpop.f32.mrf.mxu1 }
 0x4ae   :  { %v1390_v2 = vmax.f32 %v1300_v1, 0.0  ;;  %v1311_v41 = vadd.f32 %v2280_v0, %v3025_v54  ;;  %v3107_v3 = vsel %vm1412_vm0, %v1392_v5, -1e+30 }
 0x4af   :  { %1473 = vmax.xlane.f32.xlu0 %v3107_v3  ;;  %v1302_v24 = vpop.f32.mrf.mxu1 }
 0x4b0   :  { %v1393_v61 = vmax.f32 %v1311_v41, 0.0  ;;  %v1303_v27 = vadd.f32 %v3025_v54, %v1302_v24  ;;  %v3117_v59 = vsel %vm1412_vm0, %v1390_v2, -1e+30 }
 0x4b2   :  { %v1391_v63 = vmax.f32 %v1303_v27, 0.0  ;;  %v3113_v62 = vsel %vm1412_vm0, %v1393_v61, -1e+30 }
 0x4b3   :  { %1475 = vmax.xlane.f32.xlu1 %v3113_v62  ;;  %1469 = vmax.xlane.f32.xlu0 %v3117_v59 }
 0x4b4   :  { %v3123_v34 = vsel %vm1412_vm0, %v1391_v63, -1e+30 }
 0x4b7   :  { %1471 = vmax.xlane.f32.xlu1 %v3123_v34 }
 0x4b9   :  { %v2283_v44 = vpop.f32.mrf.mxu1 }
 0x4ba   :  { %v1324_v43 = vadd.f32 %v2283_v44, %v3025_v54 }
 0x4bb   :  { %v1315_v36 = vpop.f32.mrf.mxu1 }
 0x4bc   :  { %v1396_v42 = vmax.f32 %v1324_v43, 0.0  ;;  %v1316_v32 = vadd.f32 %v3025_v54, %v1315_v36 }
 0x4bd   :  { %v2284_v46 = vpop.f32.mrf.mxu1 }
 0x4be   :  { %v1394_v30 = vmax.f32 %v1316_v32, 0.0  ;;  %v1327_v33 = vadd.f32 %v2284_v46, %v3025_v54  ;;  %v3131_v26 = vsel %vm1412_vm0, %v1396_v42, -1e+30 }
 0x4bf   :  { %1481 = vmax.xlane.f32.xlu0 %v3131_v26  ;;  %v1318_v56 = vpop.f32.mrf.mxu1 }
 0x4c0   :  { %v1397_v40 = vmax.f32 %v1327_v33, 0.0  ;;  %v1319_v39 = vadd.f32 %v3025_v54, %v1318_v56  ;;  %v3141_v28 = vsel %vm1412_vm0, %v1394_v30, -1e+30 }
 0x4c2   :  { %v1395_v22 = vmax.f32 %v1319_v39, 0.0  ;;  %v3137_v25 = vsel %vm1412_vm0, %v1397_v40, -1e+30 }
 0x4c3   :  { %1483 = vmax.xlane.f32.xlu1 %v3137_v25  ;;  %1477 = vmax.xlane.f32.xlu0 %v3141_v28 }
 0x4c4   :  { %v3147_v14 = vsel %vm1412_vm0, %v1395_v22, -1e+30 }
 0x4c7   :  { %1479 = vmax.xlane.f32.xlu1 %v3147_v14 }
 0x4c9   :  { %v2287_v52 = vpop.f32.mrf.mxu1 }
 0x4ca   :  { %v1340_v53 = vadd.f32 %v2287_v52, %v3025_v54 }
 0x4cb   :  { %v1331_v45 = vpop.f32.mrf.mxu1 }
 0x4cc   :  { %v1400_v38 = vmax.f32 %v1340_v53, 0.0  ;;  %v1332_v10 = vadd.f32 %v3025_v54, %v1331_v45 }
 0x4cd   :  { %v2288_v31 = vpop.f32.mrf.mxu1 }
 0x4ce   :  { %v1398_v13 = vmax.f32 %v1332_v10, 0.0  ;;  %v1343_v11 = vadd.f32 %v2288_v31, %v3025_v54  ;;  %v3155_v15 = vsel %vm1412_vm0, %v1400_v38, -1e+30 }
 0x4cf   :  { %1489 = vmax.xlane.f32.xlu0 %v3155_v15  ;;  %v1334_v19 = vpop.f32.mrf.mxu1 }
 0x4d0   :  { %v1401_v20 = vmax.f32 %v1343_v11, 0.0  ;;  %v1335_v21 = vadd.f32 %v3025_v54, %v1334_v19  ;;  %v3165_v50 = vsel %vm1412_vm0, %v1398_v13, -1e+30 }
 0x4d2   :  { %v1399_v48 = vmax.f32 %v1335_v21, 0.0  ;;  %v3161_v17 = vsel %vm1412_vm0, %v1401_v20, -1e+30 }
 0x4d3   :  { %1491 = vmax.xlane.f32.xlu1 %v3161_v17  ;;  %1485 = vmax.xlane.f32.xlu0 %v3165_v50 }
 0x4d4   :  { %v3171_v8 = vsel %vm1412_vm0, %v1399_v48, -1e+30 }
 0x4d7   :  { %1487 = vmax.xlane.f32.xlu1 %v3171_v8 }
 0x4d9   :  { %v2291_v7 = vpop.f32.mrf.mxu1 }
 0x4da   :  { %v1356_v49 = vadd.f32 %v2291_v7, %v3025_v54 }
 0x4db   :  { %v1347_v23 = vpop.f32.mrf.mxu1 }
 0x4dc   :  { %v1404_v58 = vmax.f32 %v1356_v49, 0.0  ;;  %v1348_v6 = vadd.f32 %v3025_v54, %v1347_v23 }
 0x4dd   :  { %v2292_v5 = vpop.f32.mrf.mxu1 }
 0x4de   :  { %v1402_v1 = vmax.f32 %v1348_v6, 0.0  ;;  %v1359_v0 = vadd.f32 %v2292_v5, %v3025_v54  ;;  %v3179_v2 = vsel %vm1412_vm0, %v1404_v58, -1e+30 }
 0x4df   :  { %1497 = vmax.xlane.f32.xlu0 %v3179_v2  ;;  %v1350_v41 = vpop.f32.mrf.mxu1 }
 0x4e0   :  { %v1405_v24 = vmax.f32 %v1359_v0, 0.0  ;;  %v1351_v61 = vadd.f32 %v3025_v54, %v1350_v41  ;;  %v3189_v44 = vsel %vm1412_vm0, %v1402_v1, -1e+30 }
 0x4e2   :  { %v1403_v27 = vmax.f32 %v1351_v61, 0.0  ;;  %v3185_v63 = vsel %vm1412_vm0, %v1405_v24, -1e+30 }
 0x4e3   :  { %1499 = vmax.xlane.f32.xlu1 %v3185_v63  ;;  %1493 = vmax.xlane.f32.xlu0 %v3189_v44 }
 0x4e4   :  { %v3195_v43 = vsel %vm1412_vm0, %v1403_v27, -1e+30 }
 0x4e7   :  { %1495 = vmax.xlane.f32.xlu1 %v3195_v43 }
 0x4e9   :  { %v2295_v36 = vpop.f32.mrf.mxu1 }
 0x4ea   :  { %v1372_v32 = vadd.f32 %v2295_v36, %v3025_v54 }
 0x4eb   :  { %v1363_v42 = vpop.f32.mrf.mxu1 }
 0x4ec   :  { %v1364_v46 = vadd.f32 %v3025_v54, %v1363_v42  ;;  %v1408_v40 = vmax.f32 %v1372_v32, 0.0 }
 0x4ed   :  { %v2296_v30 = vpop.f32.mrf.mxu1 }
 0x4ee   :  { %v1406_v33 = vmax.f32 %v1364_v46, 0.0  ;;  %v1375_v39 = vadd.f32 %v2296_v30, %v3025_v54  ;;  %v3213_v10 = vsel %vm1412_vm0, %v1408_v40, -1e+30 }
 0x4ef   :  { %v1366_v56 = vpop.f32.mrf.mxu1 }
 0x4f0   :  { %v1367_v22 = vadd.f32 %v3025_v54, %v1366_v56  ;;  %v3204_v52 = vsel %vm1412_vm0, %v1406_v33, -1e+30  ;;  %v1409_v45 = vmax.f32 %v1375_v39, 0.0 }
 0x4f1   :  { %1501 = vmax.xlane.f32.xlu0 %v3204_v52 }
 0x4f2   :  { %v1407_v53 = vmax.f32 %v1367_v22, 0.0  ;;  %v3219_v54 = vsel %vm1412_vm0, %v1409_v45, -1e+30 }
 0x4f4   :  { %v3209_v38 = vsel %vm1412_vm0, %v1407_v53, -1e+30 }
 0x4f5   :  { %1503 = vmax.xlane.f32.xlu1 %v3209_v38  ;;  %1505 = vmax.xlane.f32.xlu0 %v3213_v10 }
 0x4f9   :  { %1507 = vmax.xlane.f32.xlu1 %v3219_v54 }
 0x508   :  { %v1450_v31 = vpop.xlane.xlu1 %1449 }
 0x509   :  { %v1511_v13 = vsub.f32 %v3035_v29, %v1450_v31 }
 0x50a   :  { %v1446_v11 = vpop.xlane.xlu0 %1445 }
 0x50b   :  { %v1545_v19 = vmul.f32 1.442695, %v1511_v13  ;;  %v1509_v20 = vsub.f32 %v3041_v55, %v1446_v11 }
 0x50c   :  { %v1452_v21 = vpop.xlane.xlu1 %1451 }
 0x50d   :  { %2387 = vpow2.f32 %v1545_v19  ;;  %v1541_v48 = vmul.f32 1.442695, %v1509_v20  ;;  %v1512_v7 = vsub.f32 %v3046_v57, %v1452_v21 }
 0x50e   :  { %v1448_v49 = vpop.xlane.xlu0 %1447 }
 0x50f   :  { %v1547_v23 = vmul.f32 1.442695, %v1512_v7  ;;  %v1510_v60 = vsub.f32 %v3051_v4, %v1448_v49  ;;  %2389 = vpow2.f32 %v1541_v48 }
 0x511   :  { %2391 = vpow2.f32 %v1547_v23  ;;  %v1543_v58 = vmul.f32 1.442695, %v1510_v60 }
 0x513   :  { %2393 = vpow2.f32 %v1543_v58 }
 0x518   :  { %v1458_v6 = vpop.xlane.xlu0 %1457 }
 0x519   :  { %v1515_v29 = vsub.f32 %v3059_v51, %v1458_v6 }
 0x51a   :  { %v3227_v5 = vpop.eup %2387 }
 0x51b   :  { %v1553_v1 = vmul.f32 1.442695, %v1515_v29  ;;  %1609 = vadd.xlane.f32.xlu0 %v3227_v5 }
 0x51c   :  { %v1460_v55 = vpop.xlane.xlu1 %1459  ;;  %v1454_v0 = vpop.xlane.xlu0 %1453 }
 0x51d   :  { %v3230_v41 = vpop.eup %2389  ;;  %2395 = vpow2.f32 %v1553_v1  ;;  %v1516_v57 = vsub.f32 %v3065_v37, %v1460_v55  ;;  %v1513_v4 = vsub.f32 %v3069_v35, %v1454_v0 }
 0x51e   :  { %v3234_v24 = vpop.eup %2391 }
 0x51f   :  { %v1555_v61 = vmul.f32 1.442695, %v1516_v57  ;;  %v1549_v27 = vmul.f32 1.442695, %v1513_v4  ;;  %1611 = vadd.xlane.f32.xlu1 %v3234_v24  ;;  %1605 = vadd.xlane.f32.xlu0 %v3230_v41 }
 0x520   :  { %v1456_v51 = vpop.xlane.xlu1 %1455  ;;  %v3239_v42 = vpop.eup %2393 }
 0x521   :  { %2397 = vpow2.f32 %v1555_v61  ;;  %v1514_v36 = vsub.f32 %v3075_v16, %v1456_v51 }
 0x522   :  { %2399 = vpow2.f32 %v1549_v27 }
 0x523   :  { %v1551_v32 = vmul.f32 1.442695, %v1514_v36  ;;  %1607 = vadd.xlane.f32.xlu1 %v3239_v42 }
 0x525   :  { %2401 = vpow2.f32 %v1551_v32 }
 0x528   :  { %v1466_v37 = vpop.xlane.xlu0 %1465 }
 0x529   :  { %v1519_v35 = vsub.f32 %v3083_v18, %v1466_v37 }
 0x52a   :  { %v3243_v46 = vpop.eup %2395 }
 0x52b   :  { %v1561_v30 = vmul.f32 1.442695, %v1519_v35  ;;  %1617 = vadd.xlane.f32.xlu0 %v3243_v46 }
 0x52c   :  { %v1468_v33 = vpop.xlane.xlu1 %1467  ;;  %v1462_v56 = vpop.xlane.xlu0 %1461 }
 0x52d   :  { %2403 = vpow2.f32 %v1561_v30  ;;  %v1520_v16 = vsub.f32 %v3089_v47, %v1468_v33  ;;  %v1517_v40 = vsub.f32 %v3093_v12, %v1462_v56 }
 0x52e   :  { %v3248_v39 = vpop.eup %2397 }
 0x52f   :  { %v3250_v22 = vpop.eup %2399  ;;  %v1563_v53 = vmul.f32 1.442695, %v1520_v16  ;;  %v1557_v45 = vmul.f32 1.442695, %v1517_v40  ;;  %1619 = vadd.xlane.f32.xlu1 %v3248_v39 }
 0x530   :  { %1613 = vadd.xlane.f32.xlu0 %v3250_v22  ;;  %v1464_v18 = vpop.xlane.xlu1 %1463 }
 0x531   :  { %2405 = vpow2.f32 %v1563_v53  ;;  %v1518_v31 = vsub.f32 %v3099_v9, %v1464_v18 }
 0x532   :  { %v3255_v13 = vpop.eup %2401  ;;  %2407 = vpow2.f32 %v1557_v45 }
 0x533   :  { %v1559_v47 = vmul.f32 1.442695, %v1518_v31  ;;  %1615 = vadd.xlane.f32.xlu1 %v3255_v13 }
 0x535   :  { %2409 = vpow2.f32 %v1559_v47 }
 0x538   :  { %v1474_v12 = vpop.xlane.xlu0 %1473 }
 0x539   :  { %v1523_v11 = vsub.f32 %v3107_v3, %v1474_v12 }
 0x53a   :  { %v3259_v19 = vpop.eup %2403 }
 0x53b   :  { %v1569_v20 = vmul.f32 1.442695, %v1523_v11  ;;  %1625 = vadd.xlane.f32.xlu0 %v3259_v19 }
 0x53c   :  { %v1476_v21 = vpop.xlane.xlu1 %1475  ;;  %v1470_v48 = vpop.xlane.xlu0 %1469 }
 0x53d   :  { %2411 = vpow2.f32 %v1569_v20  ;;  %v1524_v9 = vsub.f32 %v3113_v62, %v1476_v21  ;;  %v1521_v7 = vsub.f32 %v3117_v59, %v1470_v48 }
 0x53e   :  { %v3264_v49 = vpop.eup %2405 }
 0x53f   :  { %v3266_v23 = vpop.eup %2407  ;;  %v1571_v60 = vmul.f32 1.442695, %v1524_v9  ;;  %v1565_v58 = vmul.f32 1.442695, %v1521_v7  ;;  %1627 = vadd.xlane.f32.xlu1 %v3264_v49 }
 0x540   :  { %1621 = vadd.xlane.f32.xlu0 %v3266_v23  ;;  %v1472_v3 = vpop.xlane.xlu1 %1471 }
 0x541   :  { %2413 = vpow2.f32 %v1571_v60  ;;  %v1522_v6 = vsub.f32 %v3123_v34, %v1472_v3 }
 0x542   :  { %v3271_v29 = vpop.eup %2409  ;;  %2415 = vpow2.f32 %v1565_v58 }
 0x543   :  { %v1567_v62 = vmul.f32 1.442695, %v1522_v6  ;;  %1623 = vadd.xlane.f32.xlu1 %v3271_v29 }
 0x545   :  { %2417 = vpow2.f32 %v1567_v62 }
 0x548   :  { %v1482_v59 = vpop.xlane.xlu0 %1481 }
 0x549   :  { %v1527_v1 = vsub.f32 %v3131_v26, %v1482_v59 }
 0x54a   :  { %v3275_v55 = vpop.eup %2411 }
 0x54b   :  { %v1577_v0 = vmul.f32 1.442695, %v1527_v1  ;;  %1633 = vadd.xlane.f32.xlu0 %v3275_v55 }
 0x54c   :  { %v1484_v57 = vpop.xlane.xlu1 %1483  ;;  %v1478_v4 = vpop.xlane.xlu0 %1477 }
 0x54d   :  { %2419 = vpow2.f32 %v1577_v0  ;;  %v1528_v34 = vsub.f32 %v3137_v25, %v1484_v57  ;;  %v1525_v61 = vsub.f32 %v3141_v28, %v1478_v4 }
 0x54e   :  { %v3280_v27 = vpop.eup %2413 }
 0x54f   :  { %v3282_v51 = vpop.eup %2415  ;;  %v1579_v36 = vmul.f32 1.442695, %v1528_v34  ;;  %v1573_v32 = vmul.f32 1.442695, %v1525_v61  ;;  %1635 = vadd.xlane.f32.xlu1 %v3280_v27 }
 0x550   :  { %1629 = vadd.xlane.f32.xlu0 %v3282_v51  ;;  %v1480_v26 = vpop.xlane.xlu1 %1479 }
 0x551   :  { %2421 = vpow2.f32 %v1579_v36  ;;  %v1526_v37 = vsub.f32 %v3147_v14, %v1480_v26 }
 0x552   :  { %v3287_v35 = vpop.eup %2417  ;;  %2423 = vpow2.f32 %v1573_v32 }
 0x553   :  { %v1575_v25 = vmul.f32 1.442695, %v1526_v37  ;;  %1631 = vadd.xlane.f32.xlu1 %v3287_v35 }
 0x555   :  { %2425 = vpow2.f32 %v1575_v25 }
 0x558   :  { %v1490_v28 = vpop.xlane.xlu0 %1489 }
 0x559   :  { %v1531_v30 = vsub.f32 %v3155_v15, %v1490_v28 }
 0x55a   :  { %v3291_v33 = vpop.eup %2419 }
 0x55b   :  { %v1585_v56 = vmul.f32 1.442695, %v1531_v30  ;;  %1641 = vadd.xlane.f32.xlu0 %v3291_v33 }
 0x55c   :  { %v1492_v16 = vpop.xlane.xlu1 %1491  ;;  %v1486_v40 = vpop.xlane.xlu0 %1485 }
 0x55d   :  { %2427 = vpow2.f32 %v1585_v56  ;;  %v1532_v14 = vsub.f32 %v3161_v17, %v1492_v16  ;;  %v1529_v53 = vsub.f32 %v3165_v50, %v1486_v40 }
 0x55e   :  { %v3296_v45 = vpop.eup %2421 }
 0x55f   :  { %v3298_v18 = vpop.eup %2423  ;;  %v1587_v31 = vmul.f32 1.442695, %v1532_v14  ;;  %v1581_v47 = vmul.f32 1.442695, %v1529_v53  ;;  %1643 = vadd.xlane.f32.xlu1 %v3296_v45 }
 0x560   :  { %1637 = vadd.xlane.f32.xlu0 %v3298_v18  ;;  %v1488_v15 = vpop.xlane.xlu1 %1487 }
 0x561   :  { %2429 = vpow2.f32 %v1587_v31  ;;  %v1530_v12 = vsub.f32 %v3171_v8, %v1488_v15 }
 0x562   :  { %v3303_v11 = vpop.eup %2425  ;;  %2431 = vpow2.f32 %v1581_v47 }
 0x563   :  { %v1583_v17 = vmul.f32 1.442695, %v1530_v12  ;;  %1639 = vadd.xlane.f32.xlu1 %v3303_v11 }
 0x565   :  { %2433 = vpow2.f32 %v1583_v17 }
 0x568   :  { %v1498_v50 = vpop.xlane.xlu0 %1497 }
 0x569   :  { %v1535_v20 = vsub.f32 %v3179_v2, %v1498_v50 }
 0x56a   :  { %v3307_v21 = vpop.eup %2427 }
 0x56b   :  { %v1593_v48 = vmul.f32 1.442695, %v1535_v20  ;;  %1649 = vadd.xlane.f32.xlu0 %v3307_v21 }
 0x56c   :  { %v1500_v9 = vpop.xlane.xlu1 %1499  ;;  %v1494_v7 = vpop.xlane.xlu0 %1493 }
 0x56d   :  { %2435 = vpow2.f32 %v1593_v48  ;;  %v1536_v8 = vsub.f32 %v3185_v63, %v1500_v9  ;;  %v1533_v60 = vsub.f32 %v3189_v44, %v1494_v7 }
 0x56e   :  { %v3312_v58 = vpop.eup %2429 }
 0x56f   :  { %v3314_v3 = vpop.eup %2431  ;;  %v1595_v6 = vmul.f32 1.442695, %v1536_v8  ;;  %v1589_v62 = vmul.f32 1.442695, %v1533_v60  ;;  %1651 = vadd.xlane.f32.xlu1 %v3312_v58 }
 0x570   :  { %1645 = vadd.xlane.f32.xlu0 %v3314_v3  ;;  %v1496_v2 = vpop.xlane.xlu1 %1495 }
 0x571   :  { %2437 = vpow2.f32 %v1595_v6  ;;  %v1534_v59 = vsub.f32 %v3195_v43, %v1496_v2 }
 0x572   :  { %v3319_v1 = vpop.eup %2433  ;;  %2439 = vpow2.f32 %v1589_v62 }
 0x573   :  { %v1591_v63 = vmul.f32 1.442695, %v1534_v59  ;;  %1647 = vadd.xlane.f32.xlu1 %v3319_v1 }
 0x575   :  { %2441 = vpow2.f32 %v1591_v63 }
 0x57a   :  { %v3322_v44 = vpop.eup %2435  ;;  %v1502_v0 = vpop.xlane.xlu0 %1501 }
 0x57b   :  { %v1537_v57 = vsub.f32 %v3204_v52, %v1502_v0  ;;  %1657 = vadd.xlane.f32.xlu0 %v3322_v44 }
 0x57d   :  { %v1597_v4 = vmul.f32 1.442695, %v1537_v57 }
 0x57e   :  { %v3326_v34 = vpop.eup %2437  ;;  %v1504_v61 = vpop.xlane.xlu1 %1503 }
 0x57f   :  { %v1506_v36 = vpop.xlane.xlu0 %1505  ;;  %v3328_v43 = vpop.eup %2439  ;;  %2443 = vpow2.f32 %v1597_v4  ;;  %v1538_v32 = vsub.f32 %v3209_v38, %v1504_v61  ;;  %1659 = vadd.xlane.f32.xlu1 %v3326_v34 }
 0x580   :  { %v1539_v26 = vsub.f32 %v3213_v10, %v1506_v36  ;;  %1653 = vadd.xlane.f32.xlu0 %v3328_v43 }
 0x581   :  { %v1599_v37 = vmul.f32 1.442695, %v1538_v32 }
 0x582   :  { %v1601_v52 = vmul.f32 1.442695, %v1539_v26  ;;  %v3334_v25 = vpop.eup %2441  ;;  %v1508_v28 = vpop.xlane.xlu1 %1507 }
 0x583   :  { %2445 = vpow2.f32 %v1599_v37  ;;  %v1540_v30 = vsub.f32 %v3219_v54, %v1508_v28  ;;  %1655 = vadd.xlane.f32.xlu1 %v3334_v25 }
 0x584   :  { %2447 = vpow2.f32 %v1601_v52 }
 0x585   :  { %v1603_v56 = vmul.f32 1.442695, %v1540_v30 }
 0x587   :  { %2449 = vpow2.f32 %v1603_v56 }
 0x58c   :  { %v3338_v38 = vpop.eup %2443 }
 0x58d   :  { %1661 = vadd.xlane.f32.xlu0 %v3338_v38 }
 0x590   :  { %v3341_v10 = vpop.eup %2445 }
 0x591   :  { %v3343_v16 = vpop.eup %2447  ;;  %1663 = vadd.xlane.f32.xlu1 %v3341_v10 }
 0x592   :  { %1665 = vadd.xlane.f32.xlu0 %v3343_v16 }
 0x594   :  { %v3347_v40 = vpop.eup %2449 }
 0x595   :  { %1667 = vadd.xlane.f32.xlu1 %v3347_v40 }
 0x5a4   :  { %v1610_v54 = vpop.xlane.xlu0 %1609 }
 0x5a5   :  { %2451 = vrcp.f32 %v1610_v54 }
 0x5a8   :  { %v1612_v14 = vpop.xlane.xlu1 %1611  ;;  %v1606_v53 = vpop.xlane.xlu0 %1605 }
 0x5a9   :  { %2453 = vrcp.f32 %v1612_v14 }
 0x5aa   :  { %2455 = vrcp.f32 %v1606_v53 }
 0x5ac   :  { %v1608_v31 = vpop.xlane.xlu1 %1607 }
 0x5ad   :  { %2457 = vrcp.f32 %v1608_v31 }
 0x5b2   :  { %v2452_v47 = vpop.eup %2451 }
 0x5b3   :  { %v1674_v15 = vmul.f32 %v2452_v47, %v3227_v5 }
 0x5b4   :  { %v1618_v12 = vpop.xlane.xlu0 %1617 }
 0x5b5   :  { %1735 = vst [vmem:[#allocation11 + $0x10] sm:$0xff] %v1674_v15  ;;  %2459 = vrcp.f32 %v1618_v12 }
 0x5b6   :  { %v2454_v17 = vpop.eup %2453 }
 0x5b7   :  { %v2456_v50 = vpop.eup %2455  ;;  %v1676_v20 = vmul.f32 %v2454_v17, %v3234_v24 }
 0x5b8   :  { %v1670_v48 = vmul.f32 %v2456_v50, %v3230_v41  ;;  %v1620_v9 = vpop.xlane.xlu1 %1619 }
 0x5b9   :  { %1736 = vst [vmem:[#allocation11 + $0x18] sm:$0xff] %v1676_v20  ;;  %2461 = vrcp.f32 %v1620_v9  ;;  %v1614_v7 = vpop.xlane.xlu0 %1613 }
 0x5ba   :  { %v2458_v8 = vpop.eup %2457  ;;  %1733 = vst [vmem:[#allocation11] sm:$0xff] %v1670_v48  ;;  %2463 = vrcp.f32 %v1614_v7 }
 0x5bb   :  { %v1672_v60 = vmul.f32 %v2458_v8, %v3239_v42 }
 0x5bc   :  { %v1616_v6 = vpop.xlane.xlu1 %1615 }
 0x5bd   :  { %1734 = vst [vmem:[#allocation11 + $0x8] sm:$0xff] %v1672_v60  ;;  %2465 = vrcp.f32 %v1616_v6 }
 0x5c2   :  { %v2460_v5 = vpop.eup %2459 }
 0x5c3   :  { %v1682_v62 = vmul.f32 %v2460_v5, %v3243_v46 }
 0x5c4   :  { %v1626_v2 = vpop.xlane.xlu0 %1625 }
 0x5c5   :  { %1739 = vst [vmem:[#allocation11 + $0x30] sm:$0xff] %v1682_v62  ;;  %2467 = vrcp.f32 %v1626_v2 }
 0x5c6   :  { %v2462_v24 = vpop.eup %2461 }
 0x5c7   :  { %v2464_v41 = vpop.eup %2463  ;;  %v1684_v59 = vmul.f32 %v2462_v24, %v3248_v39 }
 0x5c8   :  { %v1678_v63 = vmul.f32 %v2464_v41, %v3250_v22  ;;  %v1628_v0 = vpop.xlane.xlu1 %1627 }
 0x5c9   :  { %1740 = vst [vmem:[#allocation11 + $0x38] sm:$0xff] %v1684_v59  ;;  %2469 = vrcp.f32 %v1628_v0  ;;  %v1622_v57 = vpop.xlane.xlu0 %1621 }
 0x5ca   :  { %v2466_v42 = vpop.eup %2465  ;;  %1737 = vst [vmem:[#allocation11 + $0x20] sm:$0xff] %v1678_v63  ;;  %2471 = vrcp.f32 %v1622_v57 }
 0x5cb   :  { %v1680_v4 = vmul.f32 %v2466_v42, %v3255_v13 }
 0x5cc   :  { %v1624_v61 = vpop.xlane.xlu1 %1623 }
 0x5cd   :  { %1738 = vst [vmem:[#allocation11 + $0x28] sm:$0xff] %v1680_v4  ;;  %2473 = vrcp.f32 %v1624_v61 }
 0x5d2   :  { %v2468_v46 = vpop.eup %2467 }
 0x5d3   :  { %v1690_v36 = vmul.f32 %v2468_v46, %v3259_v19 }
 0x5d4   :  { %v1634_v32 = vpop.xlane.xlu0 %1633 }
 0x5d5   :  { %1743 = vst [vmem:[#allocation11 + $0x50] sm:$0xff] %v1690_v36  ;;  %2475 = vrcp.f32 %v1634_v32 }
 0x5d6   :  { %v2470_v39 = vpop.eup %2469 }
 0x5d7   :  { %v2472_v22 = vpop.eup %2471  ;;  %v1692_v26 = vmul.f32 %v2470_v39, %v3264_v49 }
 0x5d8   :  { %v1686_v37 = vmul.f32 %v2472_v22, %v3266_v23  ;;  %v1636_v52 = vpop.xlane.xlu1 %1635 }
 0x5d9   :  { %1744 = vst [vmem:[#allocation11 + $0x58] sm:$0xff] %v1692_v26  ;;  %2477 = vrcp.f32 %v1636_v52  ;;  %v1630_v28 = vpop.xlane.xlu0 %1629 }
 0x5da   :  { %v2474_v13 = vpop.eup %2473  ;;  %1741 = vst [vmem:[#allocation11 + $0x40] sm:$0xff] %v1686_v37  ;;  %2479 = vrcp.f32 %v1630_v28 }
 0x5db   :  { %v1688_v30 = vmul.f32 %v2474_v13, %v3271_v29 }
 0x5dc   :  { %v1632_v56 = vpop.xlane.xlu1 %1631 }
 0x5dd   :  { %1742 = vst [vmem:[#allocation11 + $0x48] sm:$0xff] %v1688_v30  ;;  %2481 = vrcp.f32 %v1632_v56 }
 0x5e2   :  { %v2476_v19 = vpop.eup %2475 }
 0x5e3   :  { %v1698_v54 = vmul.f32 %v2476_v19, %v3275_v55 }
 0x5e4   :  { %v1642_v14 = vpop.xlane.xlu0 %1641 }
 0x5e5   :  { %1747 = vst [vmem:[#allocation11 + $0x70] sm:$0xff] %v1698_v54  ;;  %2483 = vrcp.f32 %v1642_v14 }
 0x5e6   :  { %v2478_v49 = vpop.eup %2477 }
 0x5e7   :  { %v2480_v23 = vpop.eup %2479  ;;  %v1700_v53 = vmul.f32 %v2478_v49, %v3280_v27 }
 0x5e8   :  { %v1694_v31 = vmul.f32 %v2480_v23, %v3282_v51  ;;  %v1644_v47 = vpop.xlane.xlu1 %1643 }
 0x5e9   :  { %1748 = vst [vmem:[#allocation11 + $0x78] sm:$0xff] %v1700_v53  ;;  %2485 = vrcp.f32 %v1644_v47  ;;  %v1638_v15 = vpop.xlane.xlu0 %1637 }
 0x5ea   :  { %v2482_v29 = vpop.eup %2481  ;;  %1745 = vst [vmem:[#allocation11 + $0x60] sm:$0xff] %v1694_v31  ;;  %2487 = vrcp.f32 %v1638_v15 }
 0x5eb   :  { %v1696_v12 = vmul.f32 %v2482_v29, %v3287_v35 }
 0x5ec   :  { %v1640_v17 = vpop.xlane.xlu1 %1639 }
 0x5ed   :  { %1746 = vst [vmem:[#allocation11 + $0x68] sm:$0xff] %v1696_v12  ;;  %2489 = vrcp.f32 %v1640_v17 }
 0x5f2   :  { %v2484_v55 = vpop.eup %2483 }
 0x5f3   :  { %v1706_v50 = vmul.f32 %v2484_v55, %v3291_v33 }
 0x5f4   :  { %v1650_v20 = vpop.xlane.xlu0 %1649 }
 0x5f5   :  { %1751 = vst [vmem:[#allocation11 + $0x90] sm:$0xff] %v1706_v50  ;;  %2491 = vrcp.f32 %v1650_v20 }
 0x5f6   :  { %v2486_v27 = vpop.eup %2485 }
 0x5f7   :  { %v2488_v51 = vpop.eup %2487  ;;  %v1708_v48 = vmul.f32 %v2486_v27, %v3296_v45 }
 0x5f8   :  { %v1702_v9 = vmul.f32 %v2488_v51, %v3298_v18  ;;  %v1652_v7 = vpop.xlane.xlu1 %1651 }
 0x5f9   :  { %1752 = vst [vmem:[#allocation11 + $0x98] sm:$0xff] %v1708_v48  ;;  %2493 = vrcp.f32 %v1652_v7  ;;  %v1646_v8 = vpop.xlane.xlu0 %1645 }
 0x5fa   :  { %v2490_v35 = vpop.eup %2489  ;;  %1749 = vst [vmem:[#allocation11 + $0x80] sm:$0xff] %v1702_v9  ;;  %2495 = vrcp.f32 %v1646_v8 }
 0x5fb   :  { %v1704_v60 = vmul.f32 %v2490_v35, %v3303_v11 }
 0x5fc   :  { %v1648_v6 = vpop.xlane.xlu1 %1647 }
 0x5fd   :  { %1750 = vst [vmem:[#allocation11 + $0x88] sm:$0xff] %v1704_v60  ;;  %2497 = vrcp.f32 %v1648_v6 }
 0x602   :  { %v2492_v33 = vpop.eup %2491 }
 0x603   :  { %v1714_v5 = vmul.f32 %v2492_v33, %v3307_v21 }
 0x604   :  { %v1658_v62 = vpop.xlane.xlu0 %1657 }
 0x605   :  { %1755 = vst [vmem:[#allocation11 + $0xb0] sm:$0xff] %v1714_v5  ;;  %2499 = vrcp.f32 %v1658_v62 }
 0x606   :  { %v2494_v45 = vpop.eup %2493 }
 0x607   :  { %v2496_v18 = vpop.eup %2495  ;;  %v1716_v2 = vmul.f32 %v2494_v45, %v3312_v58 }
 0x608   :  { %v1710_v24 = vmul.f32 %v2496_v18, %v3314_v3  ;;  %v1660_v41 = vpop.xlane.xlu1 %1659 }
 0x609   :  { %1756 = vst [vmem:[#allocation11 + $0xb8] sm:$0xff] %v1716_v2  ;;  %2501 = vrcp.f32 %v1660_v41  ;;  %v1654_v59 = vpop.xlane.xlu0 %1653 }
 0x60a   :  { %v2498_v11 = vpop.eup %2497  ;;  %1753 = vst [vmem:[#allocation11 + $0xa0] sm:$0xff] %v1710_v24  ;;  %2503 = vrcp.f32 %v1654_v59 }
 0x60b   :  { %v1712_v63 = vmul.f32 %v2498_v11, %v3319_v1 }
 0x60c   :  { %v1656_v0 = vpop.xlane.xlu1 %1655 }
 0x60d   :  { %1754 = vst [vmem:[#allocation11 + $0xa8] sm:$0xff] %v1712_v63  ;;  %2505 = vrcp.f32 %v1656_v0 }
 0x612   :  { %v2500_v21 = vpop.eup %2499 }
 0x613   :  { %v1722_v57 = vmul.f32 %v2500_v21, %v3322_v44 }
 0x615   :  { %1759 = vst [vmem:[#allocation11 + $0xd0] sm:$0xff] %v1722_v57 }
 0x616   :  { %v2502_v42 = vpop.eup %2501  ;;  %v1662_v58 = vpop.xlane.xlu0 %1661 }
 0x617   :  { %v2504_v4 = vpop.eup %2503  ;;  %v1724_v3 = vmul.f32 %v2502_v42, %v3326_v34  ;;  %2507 = vrcp.f32 %v1662_v58 }
 0x618   :  { %v1718_v61 = vmul.f32 %v2504_v4, %v3328_v43 }
 0x619   :  { %1760 = vst [vmem:[#allocation11 + $0xd8] sm:$0xff] %v1724_v3 }
 0x61a   :  { %v2506_v46 = vpop.eup %2505  ;;  %1757 = vst [vmem:[#allocation11 + $0xc0] sm:$0xff] %v1718_v61  ;;  %v1664_v36 = vpop.xlane.xlu1 %1663 }
 0x61b   :  { %v1720_v1 = vmul.f32 %v2506_v46, %v3334_v25  ;;  %2509 = vrcp.f32 %v1664_v36  ;;  %v1666_v32 = vpop.xlane.xlu0 %1665 }
 0x61c   :  { %2511 = vrcp.f32 %v1666_v32 }
 0x61d   :  { %1758 = vst [vmem:[#allocation11 + $0xc8] sm:$0xff] %v1720_v1 }
 0x61e   :  { %v1668_v44 = vpop.xlane.xlu1 %1667 }
 0x61f   :  { %2513 = vrcp.f32 %v1668_v44 }
 0x624   :  { %v2508_v39 = vpop.eup %2507 }
 0x625   :  { %v1726_v22 = vmul.f32 %v2508_v39, %v3338_v38 }
 0x627   :  { %1761 = vst [vmem:[#allocation11 + $0xe0] sm:$0xff] %v1726_v22 }
 0x628   :  { %v2510_v34 = vpop.eup %2509 }
 0x629   :  { %v2512_v26 = vpop.eup %2511  ;;  %v1728_v43 = vmul.f32 %v2510_v34, %v3341_v10 }
 0x62a   :  { %v1730_v37 = vmul.f32 %v2512_v26, %v3343_v16 }
 0x62b   :  { %1762 = vst [vmem:[#allocation11 + $0xe8] sm:$0xff] %v1728_v43 }
 0x62c   :  { %v2514_v25 = vpop.eup %2513  ;;  %1763 = vst [vmem:[#allocation11 + $0xf0] sm:$0xff] %v1730_v37 }
 0x62d   :  { %v1732_v52 = vmul.f32 %v2514_v25, %v3347_v40 }
 0x62f   :  { %1764 = vst [vmem:[#allocation11 + $0xf8] sm:$0xff] %v1732_v52 }
 0x630   :  { %2626 = shalt.err (!%p2623_p1)
}
 0x631   :  { %1776 = dma.vmem_to_hbm [thread:$0]  %s1771_s30, 4096, %s3395_s7, [#allocation4], %s2644_s27, %s2644_s27, %s2645_s28  }
 0x632   :  { %2641 = dma.done.wait [#allocation4], 4096  }
 0x633   :  { %2642 = vsyncadd [#allocation4], 4294963200 }
 0x634   :  { %1780 = vsyncpa [#allocation3], 1 }
 0x635   :  { %1781 = vsyncpa [#allocation6], 1 }
 0x636   :  { %1782 = vsyncpa [#allocation9], 1 }
 0x637   :  { %1783 = vsyncpa [#allocation4], 1 }

</bundles_post_ra>
